<compile_context>
chip_gen: v7x
topology: tpu7x:2x2x1
jax: 0.10.0
libtpu: 0.0.40
codegen_flags: <defaults>
</compile_context>

<pallas_src>
import functools
import math

import jax
import jax.numpy as jnp
from jax import lax
from jax.experimental import pallas as pl
from jax.experimental.pallas import tpu as pltpu


CFG = dict(vocab=128, n_positions=64, n_embd=32, n_head=4, n_layer=2)
EPS = 1e-5


def _gelu_new(x):
    # GPT-2 "gelu_new" (tanh approximation), f32.
    return 0.5 * x * (1.0 + jnp.tanh(
        math.sqrt(2.0 / math.pi) * (x + 0.044715 * x * x * x)))


def _layer_norm(x, g, b, eps):
    mu = jnp.mean(x, axis=-1, keepdims=True)
    var = jnp.mean((x - mu) ** 2, axis=-1, keepdims=True)
    return (x - mu) * lax.rsqrt(var + eps) * g + b


# ----------------- one fused kernel: all layers + pool + score -----------------

def _reward_kernel(x_ref, mask_ref,
                   ln1_g_ref, ln1_b_ref,
                   w_q_ref, w_k_ref, w_v_ref, b_q_ref, b_k_ref, b_v_ref,
                   w_proj_ref, b_proj_ref,
                   ln2_g_ref, ln2_b_ref,
                   w_fc_ref, b_fc_ref, w_out_ref, b_out_ref,
                   lnf_g_ref, lnf_b_ref, score_w_ref, score_b_ref,
                   o_ref,
                   resid_ref, attn_ref,
                   *, batch, seq, n_head, eps, scale):
    l = pl.program_id(0)
    B, T = batch, seq
    D = resid_ref.shape[-1]
    hd = D // n_head

    # ---- layer 0: pull the embeddings into the resident VMEM residual stream ----
    @pl.when(l == 0)
    def _():
        resid_ref[...] = x_ref[...]

    x = resid_ref[...]                                              # (B*T, D) f32

    # ---- LayerNorm 1 + Q/K/V projections (bf16 MXU, f32 accumulate) ----
    xn = _layer_norm(x, ln1_g_ref[0], ln1_b_ref[0], eps)
    xb = xn.astype(jnp.bfloat16)
    q = jnp.dot(xb, w_q_ref[0], preferred_element_type=jnp.float32) + b_q_ref[0]
    k = jnp.dot(xb, w_k_ref[0], preferred_element_type=jnp.float32) + b_k_ref[0]
    v = jnp.dot(xb, w_v_ref[0], preferred_element_type=jnp.float32) + b_v_ref[0]
    # fold attention scale into Q once (B*T x D) instead of per-head (T, T).
    q = q * jnp.float32(scale)

    # head column one-hot masks (1, D): cheap iota+cmp, no lane slicing anywhere.
    col = lax.broadcasted_iota(jnp.int32, (1, D), 1)
    head_masks = [((col >= h * hd) & (col < (h + 1) * hd)).astype(jnp.float32)
                  for h in range(n_head)]

    # causal iotas, shared by every batch row.
    rr = lax.broadcasted_iota(jnp.int32, (T, T), 0)
    cc = lax.broadcasted_iota(jnp.int32, (T, T), 1)

    # ---- attention: static unrolled loops over (batch, head); no concat ----
    for b in range(B):
        q_b = q[b * T:(b + 1) * T, :]                               # (T, D) f32
        k_b = k[b * T:(b + 1) * T, :].astype(jnp.bfloat16)
        v_b = v[b * T:(b + 1) * T, :].astype(jnp.bfloat16)

        key_keep = mask_ref[pl.ds(b, 1), :] > 0.0                   # (1, T)
        keep = (cc <= rr) & key_keep                                # (T, T)
        bias = jnp.where(keep, jnp.float32(0.0), jnp.float32(-1e9))

        acc = jnp.zeros((T, D), jnp.float32)
        for h in range(n_head):
            # masked-Q trick: (q * head_mask) @ K^T == Q_h @ K_h^T, no lane slices.
            qh = (q_b * head_masks[h]).astype(jnp.bfloat16)
            s = lax.dot_general(qh, k_b, (((1,), (1,)), ((), ())),
                                preferred_element_type=jnp.float32)  # (T, T)
            s = s + bias
            s = s - jnp.max(s, axis=-1, keepdims=True)
            p = jnp.exp(s)
            p = p * pl.reciprocal(jnp.sum(p, axis=-1, keepdims=True), approx=True)
            # (P @ V) * head_mask places head h's output in its own columns.
            acc = acc + jnp.dot(p.astype(jnp.bfloat16), v_b,
                                preferred_element_type=jnp.float32) * head_masks[h]
        attn_ref[pl.ds(b * T, T), :] = acc                           # lane-dense (T, D)

    # ---- output projection + residual ----
    proj = jnp.dot(attn_ref[...].astype(jnp.bfloat16), w_proj_ref[0],
                   preferred_element_type=jnp.float32) + b_proj_ref[0]
    x = x + proj

    # ---- LayerNorm 2 + MLP + residual ----
    x2 = _layer_norm(x, ln2_g_ref[0], ln2_b_ref[0], eps)
    h1 = jnp.dot(x2.astype(jnp.bfloat16), w_fc_ref[0],
                 preferred_element_type=jnp.float32) + b_fc_ref[0]    # (B*T, 4D)
    h1 = _gelu_new(h1)
    m = jnp.dot(h1.astype(jnp.bfloat16), w_out_ref[0],
                preferred_element_type=jnp.float32) + b_out_ref[0]    # (B*T, D)
    resid_ref[...] = x + m

    # ---- last layer: fused final LN + mean-pool(dim=1) + score head ----
    @pl.when(l == pl.num_programs(0) - 1)
    def _():
        xf = _layer_norm(resid_ref[...], lnf_g_ref[...], lnf_b_ref[...], eps)
        # mean over the sequence (incl. padding, matching .mean(dim=1)) as a
        # constant segment-sum matmul — avoids cross-sublane reductions.
        r2 = lax.broadcasted_iota(jnp.int32, (B, B * T), 0)
        c2 = lax.broadcasted_iota(jnp.int32, (B, B * T), 1)
        pool = jnp.where((c2 >= r2 * T) & (c2 < (r2 + 1) * T),
                         jnp.float32(1.0 / T), jnp.float32(0.0))      # (B, B*T)
        pooled = jnp.dot(pool, xf, preferred_element_type=jnp.float32)  # (B, D)
        # score head written as a single (1, B) row (lane-dense-ish output).
        r = lax.dot_general(score_w_ref[...], pooled, (((1,), (1,)), ((), ())),
                            preferred_element_type=jnp.float32)       # (1, B)
        o_ref[...] = r + score_b_ref[...]


def reward_forward(params, input_ids, attention_mask, cfg=CFG):
    B, T = input_ids.shape
    D = cfg["n_embd"]
    L = cfg["n_layer"]
    H = cfg["n_head"]
    scale = 1.0 / math.sqrt(D // H)

    # Embedding gather (plain-JAX glue), presented as a (B*T, D) slab.
    x = params["wte"][input_ids] + params["wpe"][jnp.arange(T)][None, :, :]
    x = x.reshape(B * T, D).astype(jnp.float32)
    mask = attention_mask.astype(jnp.float32)                          # (B, T)

    def const_spec(shape):
        # constant block index -> DMA'd once, resident for all layers.
        return pl.BlockSpec(shape, lambda l, _n=len(shape): (0,) * _n)

    def layer_spec(shape):
        # per-layer slab selected by the layer grid step (double-buffered prefetch).
        return pl.BlockSpec((1,) + shape, lambda l, _n=len(shape): (l,) + (0,) * _n)

    kernel = functools.partial(
        _reward_kernel, batch=B, seq=T, n_head=H, eps=EPS, scale=scale)

    out = pl.pallas_call(
        kernel,
        grid=(L,),
        in_specs=[
            const_spec((B * T, D)),                                   # embeddings
            const_spec((B, T)),                                       # attention mask
            layer_spec((1, D)), layer_spec((1, D)),                   # ln1 g / b
            layer_spec((D, D)), layer_spec((D, D)), layer_spec((D, D)),   # w_q/w_k/w_v
            layer_spec((1, D)), layer_spec((1, D)), layer_spec((1, D)),   # b_q/b_k/b_v
            layer_spec((D, D)), layer_spec((1, D)),                   # w_proj / b_proj
            layer_spec((1, D)), layer_spec((1, D)),                   # ln2 g / b
            layer_spec((D, 4 * D)), layer_spec((1, 4 * D)),           # w_fc / b_fc
            layer_spec((4 * D, D)), layer_spec((1, D)),               # w_out / b_out
            const_spec((1, D)), const_spec((1, D)),                   # lnf g / b
            const_spec((1, D)), const_spec((1, 1)),                   # score w / b
        ],
        out_specs=pl.BlockSpec((1, B), lambda l: (0, 0)),
        out_shape=jax.ShapeDtypeStruct((1, B), jnp.float32),
        scratch_shapes=[
            pltpu.VMEM((B * T, D), jnp.float32),    # residual stream (resident across layers)
            pltpu.VMEM((B * T, D), jnp.float32),    # attention output staging
        ],
        compiler_params=pltpu.CompilerParams(
            dimension_semantics=("arbitrary",)),    # layers are sequential
    )(x, mask,
      params["ln1_g"], params["ln1_b"],
      params["w_q"], params["w_k"], params["w_v"],
      params["b_q"], params["b_k"], params["b_v"],
      params["w_proj"], params["b_proj"],
      params["ln2_g"], params["ln2_b"],
      params["w_fc"], params["b_fc"], params["w_out"], params["b_out"],
      params["lnf_g"], params["lnf_b"], params["score_w"], params["score_b"])

    return out[0]                                                     # (B,)


# ----------------------------- params -----------------------------

def init_params(key, cfg):
    D = cfg["n_embd"]
    L = cfg["n_layer"]
    std = 0.02

    def nrm(k, shape, dtype):
        return (std * jax.random.normal(k, shape, jnp.float32)).astype(dtype)

    ks = iter(jax.random.split(key, 16))
    return {
        "wte": nrm(next(ks), (cfg["vocab"], D), jnp.float32),
        "wpe": nrm(next(ks), (cfg["n_positions"], D), jnp.float32),
        # per-layer weights stacked with a leading L axis (consumed by the layer grid)
        "ln1_g": jnp.ones((L, 1, D), jnp.float32),
        "ln1_b": jnp.zeros((L, 1, D), jnp.float32),
        "w_q": nrm(next(ks), (L, D, D), jnp.bfloat16),
        "w_k": nrm(next(ks), (L, D, D), jnp.bfloat16),
        "w_v": nrm(next(ks), (L, D, D), jnp.bfloat16),
        "b_q": jnp.zeros((L, 1, D), jnp.float32),
        "b_k": jnp.zeros((L, 1, D), jnp.float32),
        "b_v": jnp.zeros((L, 1, D), jnp.float32),
        "w_proj": nrm(next(ks), (L, D, D), jnp.bfloat16),
        "b_proj": jnp.zeros((L, 1, D), jnp.float32),
        "ln2_g": jnp.ones((L, 1, D), jnp.float32),
        "ln2_b": jnp.zeros((L, 1, D), jnp.float32),
        "w_fc": nrm(next(ks), (L, D, 4 * D), jnp.bfloat16),
        "b_fc": jnp.zeros((L, 1, 4 * D), jnp.float32),
        "w_out": nrm(next(ks), (L, 4 * D, D), jnp.bfloat16),
        "b_out": jnp.zeros((L, 1, D), jnp.float32),
        "lnf_g": jnp.ones((1, D), jnp.float32),
        "lnf_b": jnp.zeros((1, D), jnp.float32),
        "score_w": nrm(next(ks), (1, D), jnp.float32),
        "score_b": jnp.zeros((1, 1), jnp.float32),
    }


# ----------------------------- main -----------------------------

if __name__ == "__main__":
    key = jax.random.PRNGKey(0)
    k_param, k_ids = jax.random.split(key)

    B, T = 2, 8
    params = init_params(k_param, CFG)
    input_ids = jax.random.randint(k_ids, (B, T), 0, CFG["vocab"], dtype=jnp.int32)
    # last two positions of sample 1 are padding
    attention_mask = jnp.array([[1, 1, 1, 1, 1, 1, 1, 1],
                                [1, 1, 1, 1, 1, 1, 0, 0]], dtype=jnp.int32)

    fwd = jax.jit(lambda p, ids, m: reward_forward(p, ids, m))
    rewards = fwd(params, input_ids, attention_mask)
    jax.block_until_ready(rewards)
    assert rewards.shape == (B,)
    assert bool(jnp.all(jnp.isfinite(rewards)))
    print("KERNEL_OK")
</pallas_src>

<mosaic_0001>
module attributes {stable_mosaic.version = 11 : i64} {
  func.func @_reward_kernel(%arg0: i32, %arg1: memref<16x32xf32, #tpu.memory_space<vmem>>, %arg2: memref<2x8xf32, #tpu.memory_space<vmem>>, %arg3: memref<1x1x32xf32, #tpu.memory_space<vmem>>, %arg4: memref<1x1x32xf32, #tpu.memory_space<vmem>>, %arg5: memref<1x32x32xbf16, #tpu.memory_space<vmem>>, %arg6: memref<1x32x32xbf16, #tpu.memory_space<vmem>>, %arg7: memref<1x32x32xbf16, #tpu.memory_space<vmem>>, %arg8: memref<1x1x32xf32, #tpu.memory_space<vmem>>, %arg9: memref<1x1x32xf32, #tpu.memory_space<vmem>>, %arg10: memref<1x1x32xf32, #tpu.memory_space<vmem>>, %arg11: memref<1x32x32xbf16, #tpu.memory_space<vmem>>, %arg12: memref<1x1x32xf32, #tpu.memory_space<vmem>>, %arg13: memref<1x1x32xf32, #tpu.memory_space<vmem>>, %arg14: memref<1x1x32xf32, #tpu.memory_space<vmem>>, %arg15: memref<1x32x128xbf16, #tpu.memory_space<vmem>>, %arg16: memref<1x1x128xf32, #tpu.memory_space<vmem>>, %arg17: memref<1x128x32xbf16, #tpu.memory_space<vmem>>, %arg18: memref<1x1x32xf32, #tpu.memory_space<vmem>>, %arg19: memref<1x32xf32, #tpu.memory_space<vmem>>, %arg20: memref<1x32xf32, #tpu.memory_space<vmem>>, %arg21: memref<1x32xf32, #tpu.memory_space<vmem>>, %arg22: memref<1x1xf32, #tpu.memory_space<vmem>>, %arg23: memref<1x2xf32, #tpu.memory_space<vmem>>, %arg24: memref<16x32xf32, #tpu.memory_space<vmem>>, %arg25: memref<16x32xf32, #tpu.memory_space<vmem>>) attributes {dimension_semantics = [#tpu.dimension_semantics<arbitrary>], iteration_bounds = array<i64: 2>, scalar_prefetch = 0 : i64, scratch_operands = 2 : i64, tpu.core_type = #tpu.core_type<tc>, window_params = [{pipeline_mode = #tpu.pipeline_mode<synchronous>, transform_indices = @transform_0, window_bounds = array<i64: 16, 32>}, {pipeline_mode = #tpu.pipeline_mode<synchronous>, transform_indices = @transform_1, window_bounds = array<i64: 2, 8>}, {transform_indices = @transform_2, window_bounds = array<i64: 1, 1, 32>}, {transform_indices = @transform_3, window_bounds = array<i64: 1, 1, 32>}, {transform_indices = @transform_4, window_bounds = array<i64: 1, 32, 32>}, {transform_indices = @transform_5, window_bounds = array<i64: 1, 32, 32>}, {transform_indices = @transform_6, window_bounds = array<i64: 1, 32, 32>}, {transform_indices = @transform_7, window_bounds = array<i64: 1, 1, 32>}, {transform_indices = @transform_8, window_bounds = array<i64: 1, 1, 32>}, {transform_indices = @transform_9, window_bounds = array<i64: 1, 1, 32>}, {transform_indices = @transform_10, window_bounds = array<i64: 1, 32, 32>}, {transform_indices = @transform_11, window_bounds = array<i64: 1, 1, 32>}, {transform_indices = @transform_12, window_bounds = array<i64: 1, 1, 32>}, {transform_indices = @transform_13, window_bounds = array<i64: 1, 1, 32>}, {transform_indices = @transform_14, window_bounds = array<i64: 1, 32, 128>}, {transform_indices = @transform_15, window_bounds = array<i64: 1, 1, 128>}, {transform_indices = @transform_16, window_bounds = array<i64: 1, 128, 32>}, {transform_indices = @transform_17, window_bounds = array<i64: 1, 1, 32>}, {pipeline_mode = #tpu.pipeline_mode<synchronous>, transform_indices = @transform_18, window_bounds = array<i64: 1, 32>}, {pipeline_mode = #tpu.pipeline_mode<synchronous>, transform_indices = @transform_19, window_bounds = array<i64: 1, 32>}, {pipeline_mode = #tpu.pipeline_mode<synchronous>, transform_indices = @transform_20, window_bounds = array<i64: 1, 32>}, {pipeline_mode = #tpu.pipeline_mode<synchronous>, transform_indices = @transform_21, window_bounds = array<i64: 1, 1>}, {pipeline_mode = #tpu.pipeline_mode<synchronous>, transform_indices = @transform_22, window_bounds = array<i64: 1, 2>}]} {
    %c0_i32 = arith.constant 0 : i32
    %0 = arith.cmpi eq, %arg0, %c0_i32 : i32
    %1 = arith.extui %0 : i1 to i32
    %c0_i32_0 = arith.constant 0 : i32
    %2 = arith.cmpi ne, %1, %c0_i32_0 : i32
    scf.if %2 {
      %c0_125 = arith.constant 0 : index
      %c0_126 = arith.constant 0 : index
      %347 = vector.load %arg1[%c0_125, %c0_126] : memref<16x32xf32, #tpu.memory_space<vmem>>, vector<16x32xf32>
      %c0_127 = arith.constant 0 : index
      %c0_128 = arith.constant 0 : index
      %348 = vector.load %arg24[%c0_127, %c0_128] : memref<16x32xf32, #tpu.memory_space<vmem>>, vector<16x32xf32>
      tpu.vector_store %arg24[%c0_127, %c0_128], %347 {strides = array<i32>} : memref<16x32xf32, #tpu.memory_space<vmem>>, vector<16x32xf32>,
    } else {
    }
    %c0 = arith.constant 0 : index
    %c0_1 = arith.constant 0 : index
    %3 = vector.load %arg24[%c0, %c0_1] : memref<16x32xf32, #tpu.memory_space<vmem>>, vector<16x32xf32>
    %c0_2 = arith.constant 0 : index
    %c0_3 = arith.constant 0 : index
    %c0_4 = arith.constant 0 : index
    %4 = vector.load %arg3[%c0_2, %c0_3, %c0_4] : memref<1x1x32xf32, #tpu.memory_space<vmem>>, vector<1x1x32xf32>
    %5 = vector.shape_cast %4 : vector<1x1x32xf32> to vector<1x32xf32>
    %c0_5 = arith.constant 0 : index
    %c0_6 = arith.constant 0 : index
    %c0_7 = arith.constant 0 : index
    %6 = vector.load %arg4[%c0_5, %c0_6, %c0_7] : memref<1x1x32xf32, #tpu.memory_space<vmem>>, vector<1x1x32xf32>
    %7 = vector.shape_cast %6 : vector<1x1x32xf32> to vector<1x32xf32>
    %cst = arith.constant dense<0.000000e+00> : vector<16xf32>
    %8 = vector.multi_reduction <add>, %3, %cst [1] : vector<16x32xf32> to vector<16xf32>
    %9 = vector.shape_cast %8 : vector<16xf32> to vector<16x1xf32>
    %cst_8 = arith.constant 3.200000e+01 : f32
    %10 = vector.broadcast %cst_8 : f32 to vector<16x1xf32>
    %11 = arith.divf %9, %10 : vector<16x1xf32>
    %12 = vector.broadcast %11 : vector<16x1xf32> to vector<16x32xf32>
    %13 = arith.subf %3, %12 : vector<16x32xf32>
    %14 = arith.mulf %13, %13 : vector<16x32xf32>
    %cst_9 = arith.constant dense<0.000000e+00> : vector<16xf32>
    %15 = vector.multi_reduction <add>, %14, %cst_9 [1] : vector<16x32xf32> to vector<16xf32>
    %16 = vector.shape_cast %15 : vector<16xf32> to vector<16x1xf32>
    %cst_10 = arith.constant 3.200000e+01 : f32
    %17 = vector.broadcast %cst_10 : f32 to vector<16x1xf32>
    %18 = arith.divf %16, %17 : vector<16x1xf32>
    %19 = vector.broadcast %11 : vector<16x1xf32> to vector<16x32xf32>
    %20 = arith.subf %3, %19 : vector<16x32xf32>
    %cst_11 = arith.constant 9.99999974E-6 : f32
    %21 = vector.broadcast %cst_11 : f32 to vector<16x1xf32>
    %22 = arith.addf %18, %21 : vector<16x1xf32>
    %23 = math.rsqrt %22 : vector<16x1xf32>
    %24 = vector.broadcast %23 : vector<16x1xf32> to vector<16x32xf32>
    %25 = arith.mulf %20, %24 : vector<16x32xf32>
    %26 = vector.broadcast %5 : vector<1x32xf32> to vector<16x32xf32>
    %27 = arith.mulf %25, %26 : vector<16x32xf32>
    %28 = vector.broadcast %7 : vector<1x32xf32> to vector<16x32xf32>
    %29 = arith.addf %27, %28 : vector<16x32xf32>
    %30 = arith.truncf %29 : vector<16x32xf32> to vector<16x32xbf16>
    %c0_12 = arith.constant 0 : index
    %c0_13 = arith.constant 0 : index
    %c0_14 = arith.constant 0 : index
    %31 = vector.load %arg5[%c0_12, %c0_13, %c0_14] : memref<1x32x32xbf16, #tpu.memory_space<vmem>>, vector<1x32x32xbf16>
    %32 = vector.shape_cast %31 : vector<1x32x32xbf16> to vector<32x32xbf16>
    %cst_15 = arith.constant dense<0.000000e+00> : vector<16x32xf32>
    %33 = tpu.matmul %30, %32, %cst_15 {dimension_numbers = #tpu.dot_dimension_numbers<[1], [0], [0], [1], [0, 0, 1, 1], [], []>} : vector<16x32xbf16>, vector<32x32xbf16>, vector<16x32xf32> -> vector<16x32xf32>
    %c0_16 = arith.constant 0 : index
    %c0_17 = arith.constant 0 : index
    %c0_18 = arith.constant 0 : index
    %34 = vector.load %arg8[%c0_16, %c0_17, %c0_18] : memref<1x1x32xf32, #tpu.memory_space<vmem>>, vector<1x1x32xf32>
    %35 = vector.shape_cast %34 : vector<1x1x32xf32> to vector<1x32xf32>
    %36 = vector.broadcast %35 : vector<1x32xf32> to vector<16x32xf32>
    %37 = arith.addf %33, %36 : vector<16x32xf32>
    %c0_19 = arith.constant 0 : index
    %c0_20 = arith.constant 0 : index
    %c0_21 = arith.constant 0 : index
    %38 = vector.load %arg6[%c0_19, %c0_20, %c0_21] : memref<1x32x32xbf16, #tpu.memory_space<vmem>>, vector<1x32x32xbf16>
    %39 = vector.shape_cast %38 : vector<1x32x32xbf16> to vector<32x32xbf16>
    %cst_22 = arith.constant dense<0.000000e+00> : vector<16x32xf32>
    %40 = tpu.matmul %30, %39, %cst_22 {dimension_numbers = #tpu.dot_dimension_numbers<[1], [0], [0], [1], [0, 0, 1, 1], [], []>} : vector<16x32xbf16>, vector<32x32xbf16>, vector<16x32xf32> -> vector<16x32xf32>
    %c0_23 = arith.constant 0 : index
    %c0_24 = arith.constant 0 : index
    %c0_25 = arith.constant 0 : index
    %41 = vector.load %arg9[%c0_23, %c0_24, %c0_25] : memref<1x1x32xf32, #tpu.memory_space<vmem>>, vector<1x1x32xf32>
    %42 = vector.shape_cast %41 : vector<1x1x32xf32> to vector<1x32xf32>
    %43 = vector.broadcast %42 : vector<1x32xf32> to vector<16x32xf32>
    %44 = arith.addf %40, %43 : vector<16x32xf32>
    %c0_26 = arith.constant 0 : index
    %c0_27 = arith.constant 0 : index
    %c0_28 = arith.constant 0 : index
    %45 = vector.load %arg7[%c0_26, %c0_27, %c0_28] : memref<1x32x32xbf16, #tpu.memory_space<vmem>>, vector<1x32x32xbf16>
    %46 = vector.shape_cast %45 : vector<1x32x32xbf16> to vector<32x32xbf16>
    %cst_29 = arith.constant dense<0.000000e+00> : vector<16x32xf32>
    %47 = tpu.matmul %30, %46, %cst_29 {dimension_numbers = #tpu.dot_dimension_numbers<[1], [0], [0], [1], [0, 0, 1, 1], [], []>} : vector<16x32xbf16>, vector<32x32xbf16>, vector<16x32xf32> -> vector<16x32xf32>
    %c0_30 = arith.constant 0 : index
    %c0_31 = arith.constant 0 : index
    %c0_32 = arith.constant 0 : index
    %48 = vector.load %arg10[%c0_30, %c0_31, %c0_32] : memref<1x1x32xf32, #tpu.memory_space<vmem>>, vector<1x1x32xf32>
    %49 = vector.shape_cast %48 : vector<1x1x32xf32> to vector<1x32xf32>
    %50 = vector.broadcast %49 : vector<1x32xf32> to vector<16x32xf32>
    %51 = arith.addf %47, %50 : vector<16x32xf32>
    %cst_33 = arith.constant 0.353553385 : f32
    %52 = vector.broadcast %cst_33 : f32 to vector<16x32xf32>
    %53 = arith.mulf %37, %52 : vector<16x32xf32>
    %54 = tpu.iota {dimensions = array<i32: 1>} : vector<1x32xi32>
    %c0_i32_34 = arith.constant 0 : i32
    %55 = vector.broadcast %c0_i32_34 : i32 to vector<1x32xi32>
    %56 = arith.cmpi sge, %54, %55 : vector<1x32xi32>
    %c8_i32 = arith.constant 8 : i32
    %57 = vector.broadcast %c8_i32 : i32 to vector<1x32xi32>
    %58 = arith.cmpi slt, %54, %57 : vector<1x32xi32>
    %59 = arith.andi %56, %58 : vector<1x32xi1>
    %60 = arith.extui %59 : vector<1x32xi1> to vector<1x32xi32>
    %61 = arith.sitofp %60 : vector<1x32xi32> to vector<1x32xf32>
    %c8_i32_35 = arith.constant 8 : i32
    %62 = vector.broadcast %c8_i32_35 : i32 to vector<1x32xi32>
    %63 = arith.cmpi sge, %54, %62 : vector<1x32xi32>
    %c16_i32 = arith.constant 16 : i32
    %64 = vector.broadcast %c16_i32 : i32 to vector<1x32xi32>
    %65 = arith.cmpi slt, %54, %64 : vector<1x32xi32>
    %66 = arith.andi %63, %65 : vector<1x32xi1>
    %67 = arith.extui %66 : vector<1x32xi1> to vector<1x32xi32>
    %68 = arith.sitofp %67 : vector<1x32xi32> to vector<1x32xf32>
    %c16_i32_36 = arith.constant 16 : i32
    %69 = vector.broadcast %c16_i32_36 : i32 to vector<1x32xi32>
    %70 = arith.cmpi sge, %54, %69 : vector<1x32xi32>
    %c24_i32 = arith.constant 24 : i32
    %71 = vector.broadcast %c24_i32 : i32 to vector<1x32xi32>
    %72 = arith.cmpi slt, %54, %71 : vector<1x32xi32>
    %73 = arith.andi %70, %72 : vector<1x32xi1>
    %74 = arith.extui %73 : vector<1x32xi1> to vector<1x32xi32>
    %75 = arith.sitofp %74 : vector<1x32xi32> to vector<1x32xf32>
    %c24_i32_37 = arith.constant 24 : i32
    %76 = vector.broadcast %c24_i32_37 : i32 to vector<1x32xi32>
    %77 = arith.cmpi sge, %54, %76 : vector<1x32xi32>
    %c32_i32 = arith.constant 32 : i32
    %78 = vector.broadcast %c32_i32 : i32 to vector<1x32xi32>
    %79 = arith.cmpi slt, %54, %78 : vector<1x32xi32>
    %80 = arith.andi %77, %79 : vector<1x32xi1>
    %81 = arith.extui %80 : vector<1x32xi1> to vector<1x32xi32>
    %82 = arith.sitofp %81 : vector<1x32xi32> to vector<1x32xf32>
    %83 = tpu.iota {dimensions = array<i32: 0>} : vector<8x8xi32>
    %84 = tpu.iota {dimensions = array<i32: 1>} : vector<8x8xi32>
    %85 = vector.extract_strided_slice %53 {offsets = [0, 0], sizes = [8, 32], strides = [1, 1]} : vector<16x32xf32> to vector<8x32xf32>
    %86 = vector.extract_strided_slice %44 {offsets = [0, 0], sizes = [8, 32], strides = [1, 1]} : vector<16x32xf32> to vector<8x32xf32>
    %87 = arith.truncf %86 : vector<8x32xf32> to vector<8x32xbf16>
    %88 = vector.extract_strided_slice %51 {offsets = [0, 0], sizes = [8, 32], strides = [1, 1]} : vector<16x32xf32> to vector<8x32xf32>
    %89 = arith.truncf %88 : vector<8x32xf32> to vector<8x32xbf16>
    %c0_38 = arith.constant 0 : index
    %c0_39 = arith.constant 0 : index
    %90 = vector.load %arg2[%c0_38, %c0_39] : memref<2x8xf32, #tpu.memory_space<vmem>>, vector<1x8xf32>
    %cst_40 = arith.constant 0.000000e+00 : f32
    %91 = vector.broadcast %cst_40 : f32 to vector<1x8xf32>
    %92 = arith.cmpf ogt, %90, %91 : vector<1x8xf32>
    %93 = arith.cmpi sle, %84, %83 : vector<8x8xi32>
    %94 = vector.broadcast %92 : vector<1x8xi1> to vector<8x8xi1>
    %95 = arith.andi %93, %94 : vector<8x8xi1>
    %cst_41 = arith.constant 0.000000e+00 : f32
    %cst_42 = arith.constant -1.000000e+09 : f32
    %96 = vector.broadcast %cst_41 : f32 to vector<8x8xf32>
    %97 = vector.broadcast %cst_42 : f32 to vector<8x8xf32>
    %98 = arith.select %95, %96, %97 : vector<8x8xi1>, vector<8x8xf32>
    %cst_43 = arith.constant 0.000000e+00 : f32
    %99 = vector.broadcast %cst_43 : f32 to vector<8x32xf32>
    %100 = vector.broadcast %61 : vector<1x32xf32> to vector<8x32xf32>
    %101 = arith.mulf %85, %100 : vector<8x32xf32>
    %102 = arith.truncf %101 : vector<8x32xf32> to vector<8x32xbf16>
    %cst_44 = arith.constant dense<0.000000e+00> : vector<8x8xf32>
    %103 = tpu.matmul %102, %87, %cst_44 {dimension_numbers = #tpu.dot_dimension_numbers<[1], [1], [0], [0], [0, 0, 1, 0], [], []>} : vector<8x32xbf16>, vector<8x32xbf16>, vector<8x8xf32> -> vector<8x8xf32>
    %104 = arith.addf %103, %98 : vector<8x8xf32>
    %cst_45 = arith.constant dense<0xFF800000> : vector<8xf32>
    %105 = vector.multi_reduction <maximumf>, %104, %cst_45 [1] : vector<8x8xf32> to vector<8xf32>
    %106 = vector.shape_cast %105 : vector<8xf32> to vector<8x1xf32>
    %107 = vector.broadcast %106 : vector<8x1xf32> to vector<8x8xf32>
    %108 = arith.subf %104, %107 : vector<8x8xf32>
    %109 = math.exp %108 : vector<8x8xf32>
    %cst_46 = arith.constant dense<0.000000e+00> : vector<8xf32>
    %110 = vector.multi_reduction <add>, %109, %cst_46 [1] : vector<8x8xf32> to vector<8xf32>
    %111 = vector.shape_cast %110 : vector<8xf32> to vector<8x1xf32>
    %112 = tpu.reciprocal %111 {approx = true} : vector<8x1xf32> -> vector<8x1xf32>
    %113 = vector.broadcast %112 : vector<8x1xf32> to vector<8x8xf32>
    %114 = arith.mulf %109, %113 : vector<8x8xf32>
    %115 = arith.truncf %114 : vector<8x8xf32> to vector<8x8xbf16>
    %cst_47 = arith.constant dense<0.000000e+00> : vector<8x32xf32>
    %116 = tpu.matmul %115, %89, %cst_47 {dimension_numbers = #tpu.dot_dimension_numbers<[1], [0], [0], [1], [0, 0, 1, 1], [], []>} : vector<8x8xbf16>, vector<8x32xbf16>, vector<8x32xf32> -> vector<8x32xf32>
    %117 = vector.broadcast %61 : vector<1x32xf32> to vector<8x32xf32>
    %118 = arith.mulf %116, %117 : vector<8x32xf32>
    %119 = arith.addf %99, %118 : vector<8x32xf32>
    %120 = vector.broadcast %68 : vector<1x32xf32> to vector<8x32xf32>
    %121 = arith.mulf %85, %120 : vector<8x32xf32>
    %122 = arith.truncf %121 : vector<8x32xf32> to vector<8x32xbf16>
    %cst_48 = arith.constant dense<0.000000e+00> : vector<8x8xf32>
    %123 = tpu.matmul %122, %87, %cst_48 {dimension_numbers = #tpu.dot_dimension_numbers<[1], [1], [0], [0], [0, 0, 1, 0], [], []>} : vector<8x32xbf16>, vector<8x32xbf16>, vector<8x8xf32> -> vector<8x8xf32>
    %124 = arith.addf %123, %98 : vector<8x8xf32>
    %cst_49 = arith.constant dense<0xFF800000> : vector<8xf32>
    %125 = vector.multi_reduction <maximumf>, %124, %cst_49 [1] : vector<8x8xf32> to vector<8xf32>
    %126 = vector.shape_cast %125 : vector<8xf32> to vector<8x1xf32>
    %127 = vector.broadcast %126 : vector<8x1xf32> to vector<8x8xf32>
    %128 = arith.subf %124, %127 : vector<8x8xf32>
    %129 = math.exp %128 : vector<8x8xf32>
    %cst_50 = arith.constant dense<0.000000e+00> : vector<8xf32>
    %130 = vector.multi_reduction <add>, %129, %cst_50 [1] : vector<8x8xf32> to vector<8xf32>
    %131 = vector.shape_cast %130 : vector<8xf32> to vector<8x1xf32>
    %132 = tpu.reciprocal %131 {approx = true} : vector<8x1xf32> -> vector<8x1xf32>
    %133 = vector.broadcast %132 : vector<8x1xf32> to vector<8x8xf32>
    %134 = arith.mulf %129, %133 : vector<8x8xf32>
    %135 = arith.truncf %134 : vector<8x8xf32> to vector<8x8xbf16>
    %cst_51 = arith.constant dense<0.000000e+00> : vector<8x32xf32>
    %136 = tpu.matmul %135, %89, %cst_51 {dimension_numbers = #tpu.dot_dimension_numbers<[1], [0], [0], [1], [0, 0, 1, 1], [], []>} : vector<8x8xbf16>, vector<8x32xbf16>, vector<8x32xf32> -> vector<8x32xf32>
    %137 = vector.broadcast %68 : vector<1x32xf32> to vector<8x32xf32>
    %138 = arith.mulf %136, %137 : vector<8x32xf32>
    %139 = arith.addf %119, %138 : vector<8x32xf32>
    %140 = vector.broadcast %75 : vector<1x32xf32> to vector<8x32xf32>
    %141 = arith.mulf %85, %140 : vector<8x32xf32>
    %142 = arith.truncf %141 : vector<8x32xf32> to vector<8x32xbf16>
    %cst_52 = arith.constant dense<0.000000e+00> : vector<8x8xf32>
    %143 = tpu.matmul %142, %87, %cst_52 {dimension_numbers = #tpu.dot_dimension_numbers<[1], [1], [0], [0], [0, 0, 1, 0], [], []>} : vector<8x32xbf16>, vector<8x32xbf16>, vector<8x8xf32> -> vector<8x8xf32>
    %144 = arith.addf %143, %98 : vector<8x8xf32>
    %cst_53 = arith.constant dense<0xFF800000> : vector<8xf32>
    %145 = vector.multi_reduction <maximumf>, %144, %cst_53 [1] : vector<8x8xf32> to vector<8xf32>
    %146 = vector.shape_cast %145 : vector<8xf32> to vector<8x1xf32>
    %147 = vector.broadcast %146 : vector<8x1xf32> to vector<8x8xf32>
    %148 = arith.subf %144, %147 : vector<8x8xf32>
    %149 = math.exp %148 : vector<8x8xf32>
    %cst_54 = arith.constant dense<0.000000e+00> : vector<8xf32>
    %150 = vector.multi_reduction <add>, %149, %cst_54 [1] : vector<8x8xf32> to vector<8xf32>
    %151 = vector.shape_cast %150 : vector<8xf32> to vector<8x1xf32>
    %152 = tpu.reciprocal %151 {approx = true} : vector<8x1xf32> -> vector<8x1xf32>
    %153 = vector.broadcast %152 : vector<8x1xf32> to vector<8x8xf32>
    %154 = arith.mulf %149, %153 : vector<8x8xf32>
    %155 = arith.truncf %154 : vector<8x8xf32> to vector<8x8xbf16>
    %cst_55 = arith.constant dense<0.000000e+00> : vector<8x32xf32>
    %156 = tpu.matmul %155, %89, %cst_55 {dimension_numbers = #tpu.dot_dimension_numbers<[1], [0], [0], [1], [0, 0, 1, 1], [], []>} : vector<8x8xbf16>, vector<8x32xbf16>, vector<8x32xf32> -> vector<8x32xf32>
    %157 = vector.broadcast %75 : vector<1x32xf32> to vector<8x32xf32>
    %158 = arith.mulf %156, %157 : vector<8x32xf32>
    %159 = arith.addf %139, %158 : vector<8x32xf32>
    %160 = vector.broadcast %82 : vector<1x32xf32> to vector<8x32xf32>
    %161 = arith.mulf %85, %160 : vector<8x32xf32>
    %162 = arith.truncf %161 : vector<8x32xf32> to vector<8x32xbf16>
    %cst_56 = arith.constant dense<0.000000e+00> : vector<8x8xf32>
    %163 = tpu.matmul %162, %87, %cst_56 {dimension_numbers = #tpu.dot_dimension_numbers<[1], [1], [0], [0], [0, 0, 1, 0], [], []>} : vector<8x32xbf16>, vector<8x32xbf16>, vector<8x8xf32> -> vector<8x8xf32>
    %164 = arith.addf %163, %98 : vector<8x8xf32>
    %cst_57 = arith.constant dense<0xFF800000> : vector<8xf32>
    %165 = vector.multi_reduction <maximumf>, %164, %cst_57 [1] : vector<8x8xf32> to vector<8xf32>
    %166 = vector.shape_cast %165 : vector<8xf32> to vector<8x1xf32>
    %167 = vector.broadcast %166 : vector<8x1xf32> to vector<8x8xf32>
    %168 = arith.subf %164, %167 : vector<8x8xf32>
    %169 = math.exp %168 : vector<8x8xf32>
    %cst_58 = arith.constant dense<0.000000e+00> : vector<8xf32>
    %170 = vector.multi_reduction <add>, %169, %cst_58 [1] : vector<8x8xf32> to vector<8xf32>
    %171 = vector.shape_cast %170 : vector<8xf32> to vector<8x1xf32>
    %172 = tpu.reciprocal %171 {approx = true} : vector<8x1xf32> -> vector<8x1xf32>
    %173 = vector.broadcast %172 : vector<8x1xf32> to vector<8x8xf32>
    %174 = arith.mulf %169, %173 : vector<8x8xf32>
    %175 = arith.truncf %174 : vector<8x8xf32> to vector<8x8xbf16>
    %cst_59 = arith.constant dense<0.000000e+00> : vector<8x32xf32>
    %176 = tpu.matmul %175, %89, %cst_59 {dimension_numbers = #tpu.dot_dimension_numbers<[1], [0], [0], [1], [0, 0, 1, 1], [], []>} : vector<8x8xbf16>, vector<8x32xbf16>, vector<8x32xf32> -> vector<8x32xf32>
    %177 = vector.broadcast %82 : vector<1x32xf32> to vector<8x32xf32>
    %178 = arith.mulf %176, %177 : vector<8x32xf32>
    %179 = arith.addf %159, %178 : vector<8x32xf32>
    %c0_60 = arith.constant 0 : index
    %c0_61 = arith.constant 0 : index
    %180 = vector.load %arg25[%c0_60, %c0_61] : memref<16x32xf32, #tpu.memory_space<vmem>>, vector<8x32xf32>
    tpu.vector_store %arg25[%c0_60, %c0_61], %179 {strides = array<i32>} : memref<16x32xf32, #tpu.memory_space<vmem>>, vector<8x32xf32>,
    %181 = vector.extract_strided_slice %53 {offsets = [8, 0], sizes = [8, 32], strides = [1, 1]} : vector<16x32xf32> to vector<8x32xf32>
    %182 = vector.extract_strided_slice %44 {offsets = [8, 0], sizes = [8, 32], strides = [1, 1]} : vector<16x32xf32> to vector<8x32xf32>
    %183 = arith.truncf %182 : vector<8x32xf32> to vector<8x32xbf16>
    %184 = vector.extract_strided_slice %51 {offsets = [8, 0], sizes = [8, 32], strides = [1, 1]} : vector<16x32xf32> to vector<8x32xf32>
    %185 = arith.truncf %184 : vector<8x32xf32> to vector<8x32xbf16>
    %c1 = arith.constant 1 : index
    %c0_62 = arith.constant 0 : index
    %186 = vector.load %arg2[%c1, %c0_62] : memref<2x8xf32, #tpu.memory_space<vmem>>, vector<1x8xf32>
    %cst_63 = arith.constant 0.000000e+00 : f32
    %187 = vector.broadcast %cst_63 : f32 to vector<1x8xf32>
    %188 = arith.cmpf ogt, %186, %187 : vector<1x8xf32>
    %189 = arith.cmpi sle, %84, %83 : vector<8x8xi32>
    %190 = vector.broadcast %188 : vector<1x8xi1> to vector<8x8xi1>
    %191 = arith.andi %189, %190 : vector<8x8xi1>
    %cst_64 = arith.constant 0.000000e+00 : f32
    %cst_65 = arith.constant -1.000000e+09 : f32
    %192 = vector.broadcast %cst_64 : f32 to vector<8x8xf32>
    %193 = vector.broadcast %cst_65 : f32 to vector<8x8xf32>
    %194 = arith.select %191, %192, %193 : vector<8x8xi1>, vector<8x8xf32>
    %cst_66 = arith.constant 0.000000e+00 : f32
    %195 = vector.broadcast %cst_66 : f32 to vector<8x32xf32>
    %196 = vector.broadcast %61 : vector<1x32xf32> to vector<8x32xf32>
    %197 = arith.mulf %181, %196 : vector<8x32xf32>
    %198 = arith.truncf %197 : vector<8x32xf32> to vector<8x32xbf16>
    %cst_67 = arith.constant dense<0.000000e+00> : vector<8x8xf32>
    %199 = tpu.matmul %198, %183, %cst_67 {dimension_numbers = #tpu.dot_dimension_numbers<[1], [1], [0], [0], [0, 0, 1, 0], [], []>} : vector<8x32xbf16>, vector<8x32xbf16>, vector<8x8xf32> -> vector<8x8xf32>
    %200 = arith.addf %199, %194 : vector<8x8xf32>
    %cst_68 = arith.constant dense<0xFF800000> : vector<8xf32>
    %201 = vector.multi_reduction <maximumf>, %200, %cst_68 [1] : vector<8x8xf32> to vector<8xf32>
    %202 = vector.shape_cast %201 : vector<8xf32> to vector<8x1xf32>
    %203 = vector.broadcast %202 : vector<8x1xf32> to vector<8x8xf32>
    %204 = arith.subf %200, %203 : vector<8x8xf32>
    %205 = math.exp %204 : vector<8x8xf32>
    %cst_69 = arith.constant dense<0.000000e+00> : vector<8xf32>
    %206 = vector.multi_reduction <add>, %205, %cst_69 [1] : vector<8x8xf32> to vector<8xf32>
    %207 = vector.shape_cast %206 : vector<8xf32> to vector<8x1xf32>
    %208 = tpu.reciprocal %207 {approx = true} : vector<8x1xf32> -> vector<8x1xf32>
    %209 = vector.broadcast %208 : vector<8x1xf32> to vector<8x8xf32>
    %210 = arith.mulf %205, %209 : vector<8x8xf32>
    %211 = arith.truncf %210 : vector<8x8xf32> to vector<8x8xbf16>
    %cst_70 = arith.constant dense<0.000000e+00> : vector<8x32xf32>
    %212 = tpu.matmul %211, %185, %cst_70 {dimension_numbers = #tpu.dot_dimension_numbers<[1], [0], [0], [1], [0, 0, 1, 1], [], []>} : vector<8x8xbf16>, vector<8x32xbf16>, vector<8x32xf32> -> vector<8x32xf32>
    %213 = vector.broadcast %61 : vector<1x32xf32> to vector<8x32xf32>
    %214 = arith.mulf %212, %213 : vector<8x32xf32>
    %215 = arith.addf %195, %214 : vector<8x32xf32>
    %216 = vector.broadcast %68 : vector<1x32xf32> to vector<8x32xf32>
    %217 = arith.mulf %181, %216 : vector<8x32xf32>
    %218 = arith.truncf %217 : vector<8x32xf32> to vector<8x32xbf16>
    %cst_71 = arith.constant dense<0.000000e+00> : vector<8x8xf32>
    %219 = tpu.matmul %218, %183, %cst_71 {dimension_numbers = #tpu.dot_dimension_numbers<[1], [1], [0], [0], [0, 0, 1, 0], [], []>} : vector<8x32xbf16>, vector<8x32xbf16>, vector<8x8xf32> -> vector<8x8xf32>
    %220 = arith.addf %219, %194 : vector<8x8xf32>
    %cst_72 = arith.constant dense<0xFF800000> : vector<8xf32>
    %221 = vector.multi_reduction <maximumf>, %220, %cst_72 [1] : vector<8x8xf32> to vector<8xf32>
    %222 = vector.shape_cast %221 : vector<8xf32> to vector<8x1xf32>
    %223 = vector.broadcast %222 : vector<8x1xf32> to vector<8x8xf32>
    %224 = arith.subf %220, %223 : vector<8x8xf32>
    %225 = math.exp %224 : vector<8x8xf32>
    %cst_73 = arith.constant dense<0.000000e+00> : vector<8xf32>
    %226 = vector.multi_reduction <add>, %225, %cst_73 [1] : vector<8x8xf32> to vector<8xf32>
    %227 = vector.shape_cast %226 : vector<8xf32> to vector<8x1xf32>
    %228 = tpu.reciprocal %227 {approx = true} : vector<8x1xf32> -> vector<8x1xf32>
    %229 = vector.broadcast %228 : vector<8x1xf32> to vector<8x8xf32>
    %230 = arith.mulf %225, %229 : vector<8x8xf32>
    %231 = arith.truncf %230 : vector<8x8xf32> to vector<8x8xbf16>
    %cst_74 = arith.constant dense<0.000000e+00> : vector<8x32xf32>
    %232 = tpu.matmul %231, %185, %cst_74 {dimension_numbers = #tpu.dot_dimension_numbers<[1], [0], [0], [1], [0, 0, 1, 1], [], []>} : vector<8x8xbf16>, vector<8x32xbf16>, vector<8x32xf32> -> vector<8x32xf32>
    %233 = vector.broadcast %68 : vector<1x32xf32> to vector<8x32xf32>
    %234 = arith.mulf %232, %233 : vector<8x32xf32>
    %235 = arith.addf %215, %234 : vector<8x32xf32>
    %236 = vector.broadcast %75 : vector<1x32xf32> to vector<8x32xf32>
    %237 = arith.mulf %181, %236 : vector<8x32xf32>
    %238 = arith.truncf %237 : vector<8x32xf32> to vector<8x32xbf16>
    %cst_75 = arith.constant dense<0.000000e+00> : vector<8x8xf32>
    %239 = tpu.matmul %238, %183, %cst_75 {dimension_numbers = #tpu.dot_dimension_numbers<[1], [1], [0], [0], [0, 0, 1, 0], [], []>} : vector<8x32xbf16>, vector<8x32xbf16>, vector<8x8xf32> -> vector<8x8xf32>
    %240 = arith.addf %239, %194 : vector<8x8xf32>
    %cst_76 = arith.constant dense<0xFF800000> : vector<8xf32>
    %241 = vector.multi_reduction <maximumf>, %240, %cst_76 [1] : vector<8x8xf32> to vector<8xf32>
    %242 = vector.shape_cast %241 : vector<8xf32> to vector<8x1xf32>
    %243 = vector.broadcast %242 : vector<8x1xf32> to vector<8x8xf32>
    %244 = arith.subf %240, %243 : vector<8x8xf32>
    %245 = math.exp %244 : vector<8x8xf32>
    %cst_77 = arith.constant dense<0.000000e+00> : vector<8xf32>
    %246 = vector.multi_reduction <add>, %245, %cst_77 [1] : vector<8x8xf32> to vector<8xf32>
    %247 = vector.shape_cast %246 : vector<8xf32> to vector<8x1xf32>
    %248 = tpu.reciprocal %247 {approx = true} : vector<8x1xf32> -> vector<8x1xf32>
    %249 = vector.broadcast %248 : vector<8x1xf32> to vector<8x8xf32>
    %250 = arith.mulf %245, %249 : vector<8x8xf32>
    %251 = arith.truncf %250 : vector<8x8xf32> to vector<8x8xbf16>
    %cst_78 = arith.constant dense<0.000000e+00> : vector<8x32xf32>
    %252 = tpu.matmul %251, %185, %cst_78 {dimension_numbers = #tpu.dot_dimension_numbers<[1], [0], [0], [1], [0, 0, 1, 1], [], []>} : vector<8x8xbf16>, vector<8x32xbf16>, vector<8x32xf32> -> vector<8x32xf32>
    %253 = vector.broadcast %75 : vector<1x32xf32> to vector<8x32xf32>
    %254 = arith.mulf %252, %253 : vector<8x32xf32>
    %255 = arith.addf %235, %254 : vector<8x32xf32>
    %256 = vector.broadcast %82 : vector<1x32xf32> to vector<8x32xf32>
    %257 = arith.mulf %181, %256 : vector<8x32xf32>
    %258 = arith.truncf %257 : vector<8x32xf32> to vector<8x32xbf16>
    %cst_79 = arith.constant dense<0.000000e+00> : vector<8x8xf32>
    %259 = tpu.matmul %258, %183, %cst_79 {dimension_numbers = #tpu.dot_dimension_numbers<[1], [1], [0], [0], [0, 0, 1, 0], [], []>} : vector<8x32xbf16>, vector<8x32xbf16>, vector<8x8xf32> -> vector<8x8xf32>
    %260 = arith.addf %259, %194 : vector<8x8xf32>
    %cst_80 = arith.constant dense<0xFF800000> : vector<8xf32>
    %261 = vector.multi_reduction <maximumf>, %260, %cst_80 [1] : vector<8x8xf32> to vector<8xf32>
    %262 = vector.shape_cast %261 : vector<8xf32> to vector<8x1xf32>
    %263 = vector.broadcast %262 : vector<8x1xf32> to vector<8x8xf32>
    %264 = arith.subf %260, %263 : vector<8x8xf32>
    %265 = math.exp %264 : vector<8x8xf32>
    %cst_81 = arith.constant dense<0.000000e+00> : vector<8xf32>
    %266 = vector.multi_reduction <add>, %265, %cst_81 [1] : vector<8x8xf32> to vector<8xf32>
    %267 = vector.shape_cast %266 : vector<8xf32> to vector<8x1xf32>
    %268 = tpu.reciprocal %267 {approx = true} : vector<8x1xf32> -> vector<8x1xf32>
    %269 = vector.broadcast %268 : vector<8x1xf32> to vector<8x8xf32>
    %270 = arith.mulf %265, %269 : vector<8x8xf32>
    %271 = arith.truncf %270 : vector<8x8xf32> to vector<8x8xbf16>
    %cst_82 = arith.constant dense<0.000000e+00> : vector<8x32xf32>
    %272 = tpu.matmul %271, %185, %cst_82 {dimension_numbers = #tpu.dot_dimension_numbers<[1], [0], [0], [1], [0, 0, 1, 1], [], []>} : vector<8x8xbf16>, vector<8x32xbf16>, vector<8x32xf32> -> vector<8x32xf32>
    %273 = vector.broadcast %82 : vector<1x32xf32> to vector<8x32xf32>
    %274 = arith.mulf %272, %273 : vector<8x32xf32>
    %275 = arith.addf %255, %274 : vector<8x32xf32>
    %c8 = arith.constant 8 : index
    %c0_83 = arith.constant 0 : index
    %276 = vector.load %arg25[%c8, %c0_83] : memref<16x32xf32, #tpu.memory_space<vmem>>, vector<8x32xf32>
    tpu.vector_store %arg25[%c8, %c0_83], %275 {strides = array<i32>} : memref<16x32xf32, #tpu.memory_space<vmem>>, vector<8x32xf32>,
    %c0_84 = arith.constant 0 : index
    %c0_85 = arith.constant 0 : index
    %277 = vector.load %arg25[%c0_84, %c0_85] : memref<16x32xf32, #tpu.memory_space<vmem>>, vector<16x32xf32>
    %278 = arith.truncf %277 : vector<16x32xf32> to vector<16x32xbf16>
    %c0_86 = arith.constant 0 : index
    %c0_87 = arith.constant 0 : index
    %c0_88 = arith.constant 0 : index
    %279 = vector.load %arg11[%c0_86, %c0_87, %c0_88] : memref<1x32x32xbf16, #tpu.memory_space<vmem>>, vector<1x32x32xbf16>
    %280 = vector.shape_cast %279 : vector<1x32x32xbf16> to vector<32x32xbf16>
    %cst_89 = arith.constant dense<0.000000e+00> : vector<16x32xf32>
    %281 = tpu.matmul %278, %280, %cst_89 {dimension_numbers = #tpu.dot_dimension_numbers<[1], [0], [0], [1], [0, 0, 1, 1], [], []>} : vector<16x32xbf16>, vector<32x32xbf16>, vector<16x32xf32> -> vector<16x32xf32>
    %c0_90 = arith.constant 0 : index
    %c0_91 = arith.constant 0 : index
    %c0_92 = arith.constant 0 : index
    %282 = vector.load %arg12[%c0_90, %c0_91, %c0_92] : memref<1x1x32xf32, #tpu.memory_space<vmem>>, vector<1x1x32xf32>
    %283 = vector.shape_cast %282 : vector<1x1x32xf32> to vector<1x32xf32>
    %284 = vector.broadcast %283 : vector<1x32xf32> to vector<16x32xf32>
    %285 = arith.addf %281, %284 : vector<16x32xf32>
    %286 = arith.addf %3, %285 : vector<16x32xf32>
    %c0_93 = arith.constant 0 : index
    %c0_94 = arith.constant 0 : index
    %c0_95 = arith.constant 0 : index
    %287 = vector.load %arg13[%c0_93, %c0_94, %c0_95] : memref<1x1x32xf32, #tpu.memory_space<vmem>>, vector<1x1x32xf32>
    %288 = vector.shape_cast %287 : vector<1x1x32xf32> to vector<1x32xf32>
    %c0_96 = arith.constant 0 : index
    %c0_97 = arith.constant 0 : index
    %c0_98 = arith.constant 0 : index
    %289 = vector.load %arg14[%c0_96, %c0_97, %c0_98] : memref<1x1x32xf32, #tpu.memory_space<vmem>>, vector<1x1x32xf32>
    %290 = vector.shape_cast %289 : vector<1x1x32xf32> to vector<1x32xf32>
    %cst_99 = arith.constant dense<0.000000e+00> : vector<16xf32>
    %291 = vector.multi_reduction <add>, %286, %cst_99 [1] : vector<16x32xf32> to vector<16xf32>
    %292 = vector.shape_cast %291 : vector<16xf32> to vector<16x1xf32>
    %cst_100 = arith.constant 3.200000e+01 : f32
    %293 = vector.broadcast %cst_100 : f32 to vector<16x1xf32>
    %294 = arith.divf %292, %293 : vector<16x1xf32>
    %295 = vector.broadcast %294 : vector<16x1xf32> to vector<16x32xf32>
    %296 = arith.subf %286, %295 : vector<16x32xf32>
    %297 = arith.mulf %296, %296 : vector<16x32xf32>
    %cst_101 = arith.constant dense<0.000000e+00> : vector<16xf32>
    %298 = vector.multi_reduction <add>, %297, %cst_101 [1] : vector<16x32xf32> to vector<16xf32>
    %299 = vector.shape_cast %298 : vector<16xf32> to vector<16x1xf32>
    %cst_102 = arith.constant 3.200000e+01 : f32
    %300 = vector.broadcast %cst_102 : f32 to vector<16x1xf32>
    %301 = arith.divf %299, %300 : vector<16x1xf32>
    %302 = vector.broadcast %294 : vector<16x1xf32> to vector<16x32xf32>
    %303 = arith.subf %286, %302 : vector<16x32xf32>
    %cst_103 = arith.constant 9.99999974E-6 : f32
    %304 = vector.broadcast %cst_103 : f32 to vector<16x1xf32>
    %305 = arith.addf %301, %304 : vector<16x1xf32>
    %306 = math.rsqrt %305 : vector<16x1xf32>
    %307 = vector.broadcast %306 : vector<16x1xf32> to vector<16x32xf32>
    %308 = arith.mulf %303, %307 : vector<16x32xf32>
    %309 = vector.broadcast %288 : vector<1x32xf32> to vector<16x32xf32>
    %310 = arith.mulf %308, %309 : vector<16x32xf32>
    %311 = vector.broadcast %290 : vector<1x32xf32> to vector<16x32xf32>
    %312 = arith.addf %310, %311 : vector<16x32xf32>
    %313 = arith.truncf %312 : vector<16x32xf32> to vector<16x32xbf16>
    %c0_104 = arith.constant 0 : index
    %c0_105 = arith.constant 0 : index
    %c0_106 = arith.constant 0 : index
    %314 = vector.load %arg15[%c0_104, %c0_105, %c0_106] : memref<1x32x128xbf16, #tpu.memory_space<vmem>>, vector<1x32x128xbf16>
    %315 = vector.shape_cast %314 : vector<1x32x128xbf16> to vector<32x128xbf16>
    %cst_107 = arith.constant dense<0.000000e+00> : vector<16x128xf32>
    %316 = tpu.matmul %313, %315, %cst_107 {dimension_numbers = #tpu.dot_dimension_numbers<[1], [0], [0], [1], [0, 0, 1, 1], [], []>} : vector<16x32xbf16>, vector<32x128xbf16>, vector<16x128xf32> -> vector<16x128xf32>
    %c0_108 = arith.constant 0 : index
    %c0_109 = arith.constant 0 : index
    %c0_110 = arith.constant 0 : index
    %317 = vector.load %arg16[%c0_108, %c0_109, %c0_110] : memref<1x1x128xf32, #tpu.memory_space<vmem>>, vector<1x1x128xf32>
    %318 = vector.shape_cast %317 : vector<1x1x128xf32> to vector<1x128xf32>
    %319 = vector.broadcast %318 : vector<1x128xf32> to vector<16x128xf32>
    %320 = arith.addf %316, %319 : vector<16x128xf32>
    %cst_111 = arith.constant 5.000000e-01 : f32
    %321 = vector.broadcast %cst_111 : f32 to vector<16x128xf32>
    %322 = arith.mulf %321, %320 : vector<16x128xf32>
    %cst_112 = arith.constant 4.471500e-02 : f32
    %323 = vector.broadcast %cst_112 : f32 to vector<16x128xf32>
    %324 = arith.mulf %323, %320 : vector<16x128xf32>
    %325 = arith.mulf %324, %320 : vector<16x128xf32>
    %326 = arith.mulf %325, %320 : vector<16x128xf32>
    %327 = arith.addf %320, %326 : vector<16x128xf32>
    %cst_113 = arith.constant 0.797884583 : f32
    %328 = vector.broadcast %cst_113 : f32 to vector<16x128xf32>
    %329 = arith.mulf %328, %327 : vector<16x128xf32>
    %330 = math.tanh %329 : vector<16x128xf32>
    %cst_114 = arith.constant 1.000000e+00 : f32
    %331 = vector.broadcast %cst_114 : f32 to vector<16x128xf32>
    %332 = arith.addf %331, %330 : vector<16x128xf32>
    %333 = arith.mulf %322, %332 : vector<16x128xf32>
    %334 = arith.truncf %333 : vector<16x128xf32> to vector<16x128xbf16>
    %c0_115 = arith.constant 0 : index
    %c0_116 = arith.constant 0 : index
    %c0_117 = arith.constant 0 : index
    %335 = vector.load %arg17[%c0_115, %c0_116, %c0_117] : memref<1x128x32xbf16, #tpu.memory_space<vmem>>, vector<1x128x32xbf16>
    %336 = vector.shape_cast %335 : vector<1x128x32xbf16> to vector<128x32xbf16>
    %cst_118 = arith.constant dense<0.000000e+00> : vector<16x32xf32>
    %337 = tpu.matmul %334, %336, %cst_118 {dimension_numbers = #tpu.dot_dimension_numbers<[1], [0], [0], [1], [0, 0, 1, 1], [], []>} : vector<16x128xbf16>, vector<128x32xbf16>, vector<16x32xf32> -> vector<16x32xf32>
    %c0_119 = arith.constant 0 : index
    %c0_120 = arith.constant 0 : index
    %c0_121 = arith.constant 0 : index
    %338 = vector.load %arg18[%c0_119, %c0_120, %c0_121] : memref<1x1x32xf32, #tpu.memory_space<vmem>>, vector<1x1x32xf32>
    %339 = vector.shape_cast %338 : vector<1x1x32xf32> to vector<1x32xf32>
    %340 = vector.broadcast %339 : vector<1x32xf32> to vector<16x32xf32>
    %341 = arith.addf %337, %340 : vector<16x32xf32>
    %342 = arith.addf %286, %341 : vector<16x32xf32>
    %c0_122 = arith.constant 0 : index
    %c0_123 = arith.constant 0 : index
    %343 = vector.load %arg24[%c0_122, %c0_123] : memref<16x32xf32, #tpu.memory_space<vmem>>, vector<16x32xf32>
    tpu.vector_store %arg24[%c0_122, %c0_123], %342 {strides = array<i32>} : memref<16x32xf32, #tpu.memory_space<vmem>>, vector<16x32xf32>,
    %c1_i32 = arith.constant 1 : i32
    %344 = arith.cmpi eq, %arg0, %c1_i32 : i32
    %345 = arith.extui %344 : i1 to i32
    %c0_i32_124 = arith.constant 0 : i32
    %346 = arith.cmpi ne, %345, %c0_i32_124 : i32
    scf.if %346 {
      %c0_125 = arith.constant 0 : index
      %c0_126 = arith.constant 0 : index
      %347 = vector.load %arg24[%c0_125, %c0_126] : memref<16x32xf32, #tpu.memory_space<vmem>>, vector<16x32xf32>
      %c0_127 = arith.constant 0 : index
      %c0_128 = arith.constant 0 : index
      %348 = vector.load %arg19[%c0_127, %c0_128] : memref<1x32xf32, #tpu.memory_space<vmem>>, vector<1x32xf32>
      %c0_129 = arith.constant 0 : index
      %c0_130 = arith.constant 0 : index
      %349 = vector.load %arg20[%c0_129, %c0_130] : memref<1x32xf32, #tpu.memory_space<vmem>>, vector<1x32xf32>
      %cst_131 = arith.constant dense<0.000000e+00> : vector<16xf32>
      %350 = vector.multi_reduction <add>, %347, %cst_131 [1] : vector<16x32xf32> to vector<16xf32>
      %351 = vector.shape_cast %350 : vector<16xf32> to vector<16x1xf32>
      %cst_132 = arith.constant 3.200000e+01 : f32
      %352 = vector.broadcast %cst_132 : f32 to vector<16x1xf32>
      %353 = arith.divf %351, %352 : vector<16x1xf32>
      %354 = vector.broadcast %353 : vector<16x1xf32> to vector<16x32xf32>
      %355 = arith.subf %347, %354 : vector<16x32xf32>
      %356 = arith.mulf %355, %355 : vector<16x32xf32>
      %cst_133 = arith.constant dense<0.000000e+00> : vector<16xf32>
      %357 = vector.multi_reduction <add>, %356, %cst_133 [1] : vector<16x32xf32> to vector<16xf32>
      %358 = vector.shape_cast %357 : vector<16xf32> to vector<16x1xf32>
      %cst_134 = arith.constant 3.200000e+01 : f32
      %359 = vector.broadcast %cst_134 : f32 to vector<16x1xf32>
      %360 = arith.divf %358, %359 : vector<16x1xf32>
      %361 = vector.broadcast %353 : vector<16x1xf32> to vector<16x32xf32>
      %362 = arith.subf %347, %361 : vector<16x32xf32>
      %cst_135 = arith.constant 9.99999974E-6 : f32
      %363 = vector.broadcast %cst_135 : f32 to vector<16x1xf32>
      %364 = arith.addf %360, %363 : vector<16x1xf32>
      %365 = math.rsqrt %364 : vector<16x1xf32>
      %366 = vector.broadcast %365 : vector<16x1xf32> to vector<16x32xf32>
      %367 = arith.mulf %362, %366 : vector<16x32xf32>
      %368 = vector.broadcast %348 : vector<1x32xf32> to vector<16x32xf32>
      %369 = arith.mulf %367, %368 : vector<16x32xf32>
      %370 = vector.broadcast %349 : vector<1x32xf32> to vector<16x32xf32>
      %371 = arith.addf %369, %370 : vector<16x32xf32>
      %372 = tpu.iota {dimensions = array<i32: 0>} : vector<2x16xi32>
      %373 = tpu.iota {dimensions = array<i32: 1>} : vector<2x16xi32>
      %c8_i32_136 = arith.constant 8 : i32
      %374 = vector.broadcast %c8_i32_136 : i32 to vector<2x16xi32>
      %375 = arith.muli %372, %374 : vector<2x16xi32>
      %376 = arith.cmpi sge, %373, %375 : vector<2x16xi32>
      %c1_i32_137 = arith.constant 1 : i32
      %377 = vector.broadcast %c1_i32_137 : i32 to vector<2x16xi32>
      %378 = arith.addi %372, %377 : vector<2x16xi32>
      %c8_i32_138 = arith.constant 8 : i32
      %379 = vector.broadcast %c8_i32_138 : i32 to vector<2x16xi32>
      %380 = arith.muli %378, %379 : vector<2x16xi32>
      %381 = arith.cmpi slt, %373, %380 : vector<2x16xi32>
      %382 = arith.andi %376, %381 : vector<2x16xi1>
      %cst_139 = arith.constant 1.250000e-01 : f32
      %cst_140 = arith.constant 0.000000e+00 : f32
      %383 = vector.broadcast %cst_139 : f32 to vector<2x16xf32>
      %384 = vector.broadcast %cst_140 : f32 to vector<2x16xf32>
      %385 = arith.select %382, %383, %384 : vector<2x16xi1>, vector<2x16xf32>
      %cst_141 = arith.constant dense<0.000000e+00> : vector<2x32xf32>
      %386 = tpu.matmul %385, %371, %cst_141 {dimension_numbers = #tpu.dot_dimension_numbers<[1], [0], [0], [1], [0, 0, 1, 1], [], []>} : vector<2x16xf32>, vector<16x32xf32>, vector<2x32xf32> -> vector<2x32xf32>
      %c0_142 = arith.constant 0 : index
      %c0_143 = arith.constant 0 : index
      %387 = vector.load %arg21[%c0_142, %c0_143] : memref<1x32xf32, #tpu.memory_space<vmem>>, vector<1x32xf32>
      %cst_144 = arith.constant dense<0.000000e+00> : vector<1x2xf32>
      %388 = tpu.matmul %387, %386, %cst_144 {dimension_numbers = #tpu.dot_dimension_numbers<[1], [1], [0], [0], [0, 0, 1, 0], [], []>} : vector<1x32xf32>, vector<2x32xf32>, vector<1x2xf32> -> vector<1x2xf32>
      %c0_145 = arith.constant 0 : index
      %c0_146 = arith.constant 0 : index
      %389 = vector.load %arg22[%c0_145, %c0_146] : memref<1x1xf32, #tpu.memory_space<vmem>>, vector<1x1xf32>
      %390 = vector.broadcast %389 : vector<1x1xf32> to vector<1x2xf32>
      %391 = arith.addf %388, %390 : vector<1x2xf32>
      %c0_147 = arith.constant 0 : index
      %c0_148 = arith.constant 0 : index
      %392 = vector.load %arg23[%c0_147, %c0_148] : memref<1x2xf32, #tpu.memory_space<vmem>>, vector<1x2xf32>
      tpu.vector_store %arg23[%c0_147, %c0_148], %391 {strides = array<i32>} : memref<1x2xf32, #tpu.memory_space<vmem>>, vector<1x2xf32>,
    } else {
    }
    return
  }
  func.func @transform_0(%arg0: i32) -> (i32, i32) {
    %c0_i32 = arith.constant 0 : i32
    %c0_i32_0 = arith.constant 0 : i32
    %c0_i32_1 = arith.constant 0 : i32
    return %c0_i32, %c0_i32_0 : i32, i32
  }
  func.func @transform_1(%arg0: i32) -> (i32, i32) {
    %c0_i32 = arith.constant 0 : i32
    %c0_i32_0 = arith.constant 0 : i32
    %c0_i32_1 = arith.constant 0 : i32
    return %c0_i32, %c0_i32_0 : i32, i32
  }
  func.func @transform_2(%arg0: i32) -> (i32, i32, i32) {
    %c0_i32 = arith.constant 0 : i32
    %c0_i32_0 = arith.constant 0 : i32
    %c0_i32_1 = arith.constant 0 : i32
    return %arg0, %c0_i32, %c0_i32_0 : i32, i32, i32
  }
  func.func @transform_3(%arg0: i32) -> (i32, i32, i32) {
    %c0_i32 = arith.constant 0 : i32
    %c0_i32_0 = arith.constant 0 : i32
    %c0_i32_1 = arith.constant 0 : i32
    return %arg0, %c0_i32, %c0_i32_0 : i32, i32, i32
  }
  func.func @transform_4(%arg0: i32) -> (i32, i32, i32) {
    %c0_i32 = arith.constant 0 : i32
    %c0_i32_0 = arith.constant 0 : i32
    %c0_i32_1 = arith.constant 0 : i32
    return %arg0, %c0_i32, %c0_i32_0 : i32, i32, i32
  }
  func.func @transform_5(%arg0: i32) -> (i32, i32, i32) {
    %c0_i32 = arith.constant 0 : i32
    %c0_i32_0 = arith.constant 0 : i32
    %c0_i32_1 = arith.constant 0 : i32
    return %arg0, %c0_i32, %c0_i32_0 : i32, i32, i32
  }
  func.func @transform_6(%arg0: i32) -> (i32, i32, i32) {
    %c0_i32 = arith.constant 0 : i32
    %c0_i32_0 = arith.constant 0 : i32
    %c0_i32_1 = arith.constant 0 : i32
    return %arg0, %c0_i32, %c0_i32_0 : i32, i32, i32
  }
  func.func @transform_7(%arg0: i32) -> (i32, i32, i32) {
    %c0_i32 = arith.constant 0 : i32
    %c0_i32_0 = arith.constant 0 : i32
    %c0_i32_1 = arith.constant 0 : i32
    return %arg0, %c0_i32, %c0_i32_0 : i32, i32, i32
  }
  func.func @transform_8(%arg0: i32) -> (i32, i32, i32) {
    %c0_i32 = arith.constant 0 : i32
    %c0_i32_0 = arith.constant 0 : i32
    %c0_i32_1 = arith.constant 0 : i32
    return %arg0, %c0_i32, %c0_i32_0 : i32, i32, i32
  }
  func.func @transform_9(%arg0: i32) -> (i32, i32, i32) {
    %c0_i32 = arith.constant 0 : i32
    %c0_i32_0 = arith.constant 0 : i32
    %c0_i32_1 = arith.constant 0 : i32
    return %arg0, %c0_i32, %c0_i32_0 : i32, i32, i32
  }
  func.func @transform_10(%arg0: i32) -> (i32, i32, i32) {
    %c0_i32 = arith.constant 0 : i32
    %c0_i32_0 = arith.constant 0 : i32
    %c0_i32_1 = arith.constant 0 : i32
    return %arg0, %c0_i32, %c0_i32_0 : i32, i32, i32
  }
  func.func @transform_11(%arg0: i32) -> (i32, i32, i32) {
    %c0_i32 = arith.constant 0 : i32
    %c0_i32_0 = arith.constant 0 : i32
    %c0_i32_1 = arith.constant 0 : i32
    return %arg0, %c0_i32, %c0_i32_0 : i32, i32, i32
  }
  func.func @transform_12(%arg0: i32) -> (i32, i32, i32) {
    %c0_i32 = arith.constant 0 : i32
    %c0_i32_0 = arith.constant 0 : i32
    %c0_i32_1 = arith.constant 0 : i32
    return %arg0, %c0_i32, %c0_i32_0 : i32, i32, i32
  }
  func.func @transform_13(%arg0: i32) -> (i32, i32, i32) {
    %c0_i32 = arith.constant 0 : i32
    %c0_i32_0 = arith.constant 0 : i32
    %c0_i32_1 = arith.constant 0 : i32
    return %arg0, %c0_i32, %c0_i32_0 : i32, i32, i32
  }
  func.func @transform_14(%arg0: i32) -> (i32, i32, i32) {
    %c0_i32 = arith.constant 0 : i32
    %c0_i32_0 = arith.constant 0 : i32
    %c0_i32_1 = arith.constant 0 : i32
    return %arg0, %c0_i32, %c0_i32_0 : i32, i32, i32
  }
  func.func @transform_15(%arg0: i32) -> (i32, i32, i32) {
    %c0_i32 = arith.constant 0 : i32
    %c0_i32_0 = arith.constant 0 : i32
    %c0_i32_1 = arith.constant 0 : i32
    return %arg0, %c0_i32, %c0_i32_0 : i32, i32, i32
  }
  func.func @transform_16(%arg0: i32) -> (i32, i32, i32) {
    %c0_i32 = arith.constant 0 : i32
    %c0_i32_0 = arith.constant 0 : i32
    %c0_i32_1 = arith.constant 0 : i32
    return %arg0, %c0_i32, %c0_i32_0 : i32, i32, i32
  }
  func.func @transform_17(%arg0: i32) -> (i32, i32, i32) {
    %c0_i32 = arith.constant 0 : i32
    %c0_i32_0 = arith.constant 0 : i32
    %c0_i32_1 = arith.constant 0 : i32
    return %arg0, %c0_i32, %c0_i32_0 : i32, i32, i32
  }
  func.func @transform_18(%arg0: i32) -> (i32, i32) {
    %c0_i32 = arith.constant 0 : i32
    %c0_i32_0 = arith.constant 0 : i32
    %c0_i32_1 = arith.constant 0 : i32
    return %c0_i32, %c0_i32_0 : i32, i32
  }
  func.func @transform_19(%arg0: i32) -> (i32, i32) {
    %c0_i32 = arith.constant 0 : i32
    %c0_i32_0 = arith.constant 0 : i32
    %c0_i32_1 = arith.constant 0 : i32
    return %c0_i32, %c0_i32_0 : i32, i32
  }
  func.func @transform_20(%arg0: i32) -> (i32, i32) {
    %c0_i32 = arith.constant 0 : i32
    %c0_i32_0 = arith.constant 0 : i32
    %c0_i32_1 = arith.constant 0 : i32
    return %c0_i32, %c0_i32_0 : i32, i32
  }
  func.func @transform_21(%arg0: i32) -> (i32, i32) {
    %c0_i32 = arith.constant 0 : i32
    %c0_i32_0 = arith.constant 0 : i32
    %c0_i32_1 = arith.constant 0 : i32
    return %c0_i32, %c0_i32_0 : i32, i32
  }
  func.func @transform_22(%arg0: i32) -> (i32, i32) {
    %c0_i32 = arith.constant 0 : i32
    %c0_i32_0 = arith.constant 0 : i32
    %c0_i32_1 = arith.constant 0 : i32
    return %c0_i32, %c0_i32_0 : i32, i32
  }
}

</mosaic_0001>

<bundles_post_ra>
// kernel: _lambda_.1
= control target key start
LH: loop header
LB: loop body
LE: loop exit
PB: predicated region body
PF: predicated region fallthrough
CT: control target
= control target key end

     0   :  { %s3805_s0 = inlined_call_operand.vmem [shape: f32[16,32], index: 0, kind: input, shape index: {}]   ;;  %s3806_s1 = inlined_call_operand.vmem [shape: f32[2,8], index: 1, kind: input, shape index: {}]   ;;  %s3807_s2 = inlined_call_operand.vmem [shape: f32[2,1,32], index: 2, kind: input, shape index: {}]   ;;  %s3808_s3 = inlined_call_operand.vmem [shape: f32[2,1,32], index: 3, kind: input, shape index: {}]   ;;  %s3809_s4 = inlined_call_operand.vmem [shape: bf16[2,32,32], index: 4, kind: input, shape index: {}]   ;;  %s3810_s5 = inlined_call_operand.vmem [shape: bf16[2,32,32], index: 5, kind: input, shape index: {}]   ;;  %s3811_s6 = inlined_call_operand.vmem [shape: bf16[2,32,32], index: 6, kind: input, shape index: {}]   ;;  %s3812_s7 = inlined_call_operand.vmem [shape: f32[2,1,32], index: 7, kind: input, shape index: {}]   ;;  %s3813_s8 = inlined_call_operand.vmem [shape: f32[2,1,32], index: 8, kind: input, shape index: {}]   ;;  %s3814_s9 = inlined_call_operand.vmem [shape: f32[2,1,32], index: 9, kind: input, shape index: {}]   ;;  %s3815_s10 = inlined_call_operand.vmem [shape: bf16[2,32,32], index: 10, kind: input, shape index: {}]   ;;  %s3816_s11 = inlined_call_operand.vmem [shape: f32[2,1,32], index: 11, kind: input, shape index: {}]   ;;  %s3817_s12 = inlined_call_operand.vmem [shape: f32[2,1,32], index: 12, kind: input, shape index: {}]   ;;  %s3818_s13 = inlined_call_operand.vmem [shape: f32[2,1,32], index: 13, kind: input, shape index: {}]   ;;  %s3819_s14 = inlined_call_operand.vmem [shape: bf16[2,32,128], index: 14, kind: input, shape index: {}]   ;;  %s3820_s15 = inlined_call_operand.vmem [shape: f32[2,1,128], index: 15, kind: input, shape index: {}]   ;;  %s3821_s16 = inlined_call_operand.vmem [shape: bf16[2,128,32], index: 16, kind: input, shape index: {}]   ;;  %s3822_s17 = inlined_call_operand.vmem [shape: f32[2,1,32], index: 17, kind: input, shape index: {}]   ;;  %s3823_s18 = inlined_call_operand.vmem [shape: f32[1,32], index: 18, kind: input, shape index: {}]   ;;  %s3824_s19 = inlined_call_operand.vmem [shape: f32[1,32], index: 19, kind: input, shape index: {}]   ;;  %s3825_s20 = inlined_call_operand.vmem [shape: f32[1,32], index: 20, kind: input, shape index: {}]   ;;  %s3826_s21 = inlined_call_operand.<no memory space> [shape: f32[1,1], index: 21, kind: input, shape index: {}]   ;;  %s3827_s22 = inlined_call_operand.hbm [shape: f32[1,2], index: 22, kind: output, shape index: {}]  }
   0x1   :  { %3833 = sst [smem:[#allocation10_spill]] %s3805_s0  ;;  %v27_v0 = vstv %s3826_s21 }
   0x2   :  { %3834 = sst [smem:[#allocation11_spill]] %s3806_s1  ;;  %28 = vst [vmem:[#allocation4] sm:$0x1] %v27_v0 }
   0x3   :  { %3835 = sst [smem:[#allocation12_spill]] %s3807_s2 }
   0x4   :  { %3836 = sst [smem:[#allocation13_spill]] %s3808_s3 }
   0x5   :  { %3837 = sst [smem:[#allocation14_spill]] %s3809_s4 }
   0x6   :  { %3838 = sst [smem:[#allocation15_spill]] %s3810_s5 }
   0x7   :  { %3839 = sst [smem:[#allocation16_spill]] %s3811_s6 }
   0x8   :  { %3840 = sst [smem:[#allocation17_spill]] %s3812_s7 }
   0x9   :  { %3841 = sst [smem:[#allocation18_spill]] %s3815_s10 }
   0xa   :  { %3842 = sst [smem:[#allocation19_spill]] %s3823_s18 }
   0xb   :  { %3843 = sst [smem:[#allocation20_spill]] %s3824_s19 }
   0xc   :  { %3844 = sst [smem:[#allocation21_spill]] %s3825_s20 }
   0xd   :  { %3845 = sst [smem:[#allocation22_spill]] %s3827_s22 }
   0xe   :  { %29 = vsyncpa [#allocation6], 0  ;;  %s3357_s29 = smov 0  }
   0xf LB: > { %3846 = sst [smem:[#allocation8_spill]] %s3228_s29  ;;  %s3363_s30 = sadd.s32 4294967295, %s3228_s29   ;;  %s3228_s29 = sphi %s3357_s29, %s35_s29  }
  0x10   : > { %p2787_p0 = scmp.ge.s32.totalorder %s3228_s29, 1  ;;  %p740_p1 = scmp.lt.s32.totalorder %s3228_s29, 3 }
  0x12   : > { %p741_p2 = pnand %p2787_p0, %p740_p1 }
  0x14   : > { %744 = sbr.rel (%p741_p2) target bundleno = 3199 (0xc7f), region = 108 }
  0x1b   : > { %p852_p3 = scmp.lt.s32.totalorder %s3363_s30, 1  ;;  %s3850_s0 = sld [smem:[#allocation14_spill]] }
  0x1c   : > { %s3851_s19 = sld [smem:[#allocation15_spill]]  ;;  %s3852_s5 = sld [smem:[#allocation16_spill]] }
  0x1d   : > { %s3369_s21 = scalar_select %p852_p3, %s3363_s30, 1 }
  0x1e   : > { %s3854_s10 = sld [smem:[#allocation18_spill]]  ;;  %p2800_p4 = scmp.ne.s32.totalorder %s3363_s30, 0 }
  0x1f   : > { %s2864_s26 = sshll.u32 %s3369_s21, 4  ;;  %s895_s6 = scalar_lea.vmem %s3818_s13, %s3369_s21  ;;  %vm919_vm0 = vcmask (!%p2800_p4), 261120  }
  0x20   : > { %s3427_s27 = scalar_lea.vmem %s3819_s14, %s2864_s26  ;;  %s903_s28 = scalar_lea.vmem %s3820_s15, %s3369_s21 }
  0x21   : > { %s3387_s29 = scalar_lea.vmem %s3850_s0, %s2864_s26  ;;  %916 = sbr.rel (%p2800_p4) target bundleno = 46 (0x2e), region = 112 }
  0x22   : > { %s3392_s18 = scalar_lea.vmem %s3851_s19, %s2864_s26  ;;  %s3397_s24 = scalar_lea.vmem %s3852_s5, %s2864_s26 }
  0x23   : > { %3853 = sst [smem:[#allocation9_spill]] %s3397_s24  ;;  %s892_s5 = scalar_lea.vmem %s3817_s12, %s3369_s21 }
  0x24   : > { %s3410_s7 = scalar_lea.vmem %s3854_s10, %s2864_s26  ;;  %s2869_s10 = sshll.u32 %s3369_s21, 6 }
  0x25   : > { %s3437_s22 = scalar_lea.vmem %s3821_s16, %s2869_s10  ;;  %s911_s24 = scalar_lea.vmem %s3822_s17, %s3369_s21 }
  0x26   : > { %s3855_s25 = sld [smem:[#allocation10_spill]] (!%p2800_p4) }
  0x2c   : > { %v917_v1 = vld [vmem:[%s3855_s25] sm:$0xff]  ;;  %v918_v2 = vld [vmem:[%s3855_s25 + $0x8] sm:$0xff] }
  0x2d   : > { %920 = vst.msk [vmem:[#allocation2] sm:$0xff] %vm919_vm0, %v917_v1  ;;  %921 = vst.msk [vmem:[#allocation2 + $0x8] sm:$0xff] %vm919_vm0, %v918_v2 }
  0x2e PF: > { %vm926_vm1 = vcmask 261120   ;;  %v3125_v17 = vld [vmem:[%s3387_s29] sm:$0xff]   ;;  %v3230_v18 = vmov 0.0   ;;  %v3126_v19 = vld [vmem:[%s3387_s29 + $0x8] sm:$0xff]   ;;  %vm3231_vm2 = vmmov 0   ;;  %s3856_s0 = sld [smem:[#allocation12_spill]]  ;;  %v1168_v42 = vlaneseq  ;;  %s3864_s23 = scalar_lea.vmem %s3814_s9, %s3369_s21 }
  0x2f   : > { %2931 = vmatprep.subr.bf16.mxu0 %v3230_v18  ;;  %2955 = vmatprep.subr.bf16.mxu1 %v3230_v18  ;;  %s3858_s20 = sld [smem:[#allocation9_spill]]  ;;  %s3859_s2 = sld [smem:[#allocation13_spill]]  ;;  %v3127_v36 = vld [vmem:[%s3392_s18] sm:$0xff]   ;;  %v3128_v38 = vld [vmem:[%s3392_s18 + $0x8] sm:$0xff]   ;;  %vm1269_vm7 = vcmask 1043456  }
  0x30   : > { %2932 = vmatpush3.bf16.msra.mxu0 %v3125_v17  ;;  %2935 = vmatprep.mubr.msk.bf16.mxu0 %vm3231_vm2, %v3230_v18  ;;  %s3861_s4 = sld [smem:[#allocation17_spill]]  ;;  %v3507_v47 = vand.u32 127, %v1168_v42  ;;  %v2811_v59 = vld [vmem:[%s3864_s23] ss:$0 sm:$0xff]  ;;  %s3865_s18 = sld [smem:[#allocation11_spill]] }
  0x31   : > { %2933 = vmatprep.subr.bf16.mxu0 %v3230_v18  ;;  %2957 = vmatprep.mubr.msk.bf16.mxu1 %vm3231_vm2, %v3230_v18  ;;  %s3866_s29 = scalar_lea.vmem %s3816_s11, %s3369_s21  ;;  %p2854_p5 = scmp.ne.s32.totalorder %s3363_s30, 1 }
  0x32   : > { %vm1171_vm3 = vcmp.lt.s32.totalorder %v3507_v47, 8  ;;  %vm1175_vm4 = vcmp.ge.s32.totalorder %v3507_v47, 8  ;;  %vm1176_vm5 = vcmp.lt.s32.totalorder %v3507_v47, 16  ;;  %vm1180_vm8 = vcmp.ge.s32.totalorder %v3507_v47, 16  ;;  %s3867_s1 = sld [smem:[#allocation19_spill]] (!%p2854_p5) }
  0x33   : > { %v3516_v57 = vsel %vm1171_vm3, 1.0, %v3230_v18  ;;  %vm1177_vm6 = vmand %vm1175_vm4, %vm1176_vm5  ;;  %vm1181_vm9 = vcmp.lt.s32.totalorder %v3507_v47, 24  ;;  %vm1185_vm11 = vcmp.ge.s32.totalorder %v3507_v47, 24  ;;  %vm1186_vm12 = vcmp.lt.s32.totalorder %v3507_v47, 32 }
  0x34   : > { %v3450_v3 = vld [vmem:[#allocation2] sm:$0xff]  ;;  %v3452_v4 = vld [vmem:[#allocation2 + $0x8] sm:$0xff]  ;;  %2934 = vmatpush3.bf16.msra.mxu0 %v3126_v19  ;;  %s3857_s19 = scalar_lea.vmem %s3856_s0, %s3369_s21  ;;  %vm1182_vm10 = vmand %vm1180_vm8, %vm1181_vm9  ;;  %vm1253_vm4 = vcmask 64512  }
  0x35   : > { %v927_v5 = vsel %vm926_vm1, %v3450_v3, 0.0  ;;  %v930_v6 = vsel %vm926_vm1, %v3452_v4, 0.0  ;;  %2939 = vmatprep.subr.bf16.mxu0 %v3230_v18  ;;  %v2801_v28 = vld [vmem:[%s3857_s19] ss:$0 sm:$0xff]  ;;  %s3860_s26 = scalar_lea.vmem %s3859_s2, %s3369_s21  ;;  %v3130_v40 = vld [vmem:[%s3858_s20 + $0x8] sm:$0xff]   ;;  %s3863_s19 = scalar_lea.vmem %s3813_s8, %s3369_s21  ;;  %vm1187_vm13 = vmand %vm1185_vm11, %vm1186_vm12  ;;  %vm2425_vm11 = vcmask (!%p2854_p5), 130048  }
  0x36   : > { %928 = vadd.xlane.f32.xlu0 %v927_v5  ;;  %v2802_v32 = vld [vmem:[%s3860_s26] ss:$0 sm:$0xff]  ;;  %s3862_s10 = scalar_lea.vmem %s3861_s4, %s3369_s21  ;;  %s3868_s26 = sld [smem:[#allocation20_spill]] (!%p2854_p5)  ;;  %vm2586_vm12 = vcmask (!%p2854_p5), 8192  }
  0x37   : > { %v3129_v39 = vld [vmem:[%s3858_s20] sm:$0xff]  }
  0x38   : > { %v2803_v46 = vld [vmem:[%s3862_s10] ss:$0 sm:$0xff] }
  0x39   : > { %v2807_v48 = vld [vmem:[%s3863_s19] ss:$0 sm:$0xff] }
  0x3a   : > { %931 = vadd.xlane.f32.xlu0 %v930_v6 }
  0xc3   : > { %v929_v7 = vpop.xlane.xlu0 %928 }
  0xc4   : > { %v934_v8 = vmul.f32 0.03125, %v929_v7  ;;  %v3529_v7 = vsel %vm1177_vm6, 1.0, %v3230_v18 }
  0xc6   : > { %v936_v9 = vsub.f32 %v3450_v3, %v934_v8 }
  0xc7   : > { %v932_v10 = vpop.xlane.xlu0 %931 }
  0xc8   : > { %v935_v11 = vmul.f32 0.03125, %v932_v10  ;;  %v938_v12 = vmul.f32 %v936_v9, %v936_v9 }
  0xca   : > { %v937_v13 = vsub.f32 %v3452_v4, %v935_v11  ;;  %v940_v14 = vsel %vm926_vm1, %v938_v12, 0.0 }
  0xcb   : > { %941 = vadd.xlane.f32.xlu1 %v940_v14 }
  0xcc   : > { %v939_v15 = vmul.f32 %v937_v13, %v937_v13 }
  0xce   : > { %v943_v16 = vsel %vm926_vm1, %v939_v15, 0.0 }
  0xcf   : > { %944 = vadd.xlane.f32.xlu1 %v943_v16  ;;  %v3555_v16 = vsel %vm1187_vm13, 1.0, %v3230_v18 }
 0x158   : > { %v942_v20 = vpop.xlane.xlu1 %941 }
 0x159   : > { %v946_v21 = vmul.f32 0.03125, %v942_v20 }
 0x15b   : > { %v948_v22 = vadd.f32 1e-05, %v946_v21 }
 0x15c   : > { %v945_v23 = vpop.xlane.xlu1 %944 }
 0x15d   : > { %3143 = vrsqrt.f32 %v948_v22  ;;  %v947_v24 = vmul.f32 0.03125, %v945_v23 }
 0x15f   : > { %v949_v25 = vadd.f32 1e-05, %v947_v24 }
 0x161   : > { %3145 = vrsqrt.f32 %v949_v25 }
 0x167   : > { %v3144_v26 = vpop.eup %3143 }
 0x168   : > { %v952_v27 = vmul.f32 %v3144_v26, %v936_v9 }
 0x16a   : > { %v960_v31 = vmul.f32 %v2801_v28, %v952_v27 }
 0x16b   : > { %v3146_v29 = vpop.eup %3145 }
 0x16c   : > { %v953_v30 = vmul.f32 %v3146_v29, %v937_v13  ;;  %v968_v34 = vadd.f32 %v2802_v32, %v960_v31  ;;  %v3545_v13 = vsel %vm1182_vm10, 1.0, %v3230_v18 }
 0x16e   : > { %v961_v33 = vmul.f32 %v2801_v28, %v953_v30 }
 0x170   : > { %v969_v35 = vadd.f32 %v2802_v32, %v961_v33  ;;  %v1194_v33 = vld [vmem:[%s3865_s18] sm:$0x1] }
 0x171   : > { %vm1195_vm14 = vcmp.gt.f32.partialorder %v1194_v33, 0.0 }
 0x172   : > { %v970_v37 = vpack.c.bf16 %v969_v35, %v968_v34  ;;  %v3591_v34 = vshrl.u32 %v1168_v42, 7 }
 0x174   : > { %2936 = vmatmul.mubr.msk.bf16.vlgmr.msra.gmra.mrb[0].mxu0 %vm926_vm1, %v970_v37  ;;  %v3594_v35 = vsub.s32 0, %v3591_v34  ;;  %vm1196_vm15 = vcmp.le.s32.totalorder %v3507_v47, %v3591_v34 }
 0x175   : > { %2940 = vmatpush3.bf16.msra.mxu0 %v3127_v36  ;;  %2943 = vmatprep.mubr.msk.bf16.mxu0 %vm3231_vm2, %v3230_v18  ;;  %v3232_v36 = vmov 0  }
 0x176   : > { %2941 = vmatprep.subr.bf16.mxu0 %v3230_v18 }
 0x179   : > { %2942 = vmatpush3.bf16.msra.mxu0 %v3128_v38 }
 0x17a   : > { %2947 = vmatprep.subr.bf16.mxu0 %v3230_v18 }
 0x17c   : > { %2944 = vmatmul.mubr.msk.bf16.vlgmr.msra.gmra.mrb[4].mxu0 %vm926_vm1, %v970_v37 }
 0x17d   : > { %2948 = vmatpush3.bf16.msra.mxu0 %v3129_v39  ;;  %2951 = vmatprep.mubr.msk.bf16.mxu0 %vm3231_vm2, %v3230_v18  ;;  %v3233_v39 = vmov -1e+09  }
 0x17e   : > { %2949 = vmatprep.subr.bf16.mxu0 %v3230_v18 }
 0x181   : > { %2950 = vmatpush3.bf16.msra.mxu0 %v3130_v40 }
 0x182   : > { %2961 = vmatprep.subr.bf16.mxu0 %v3230_v18 }
 0x184   : > { %2952 = vmatmul.mubr.msk.bf16.vlgmr.msra.gmra.mrb[8].mxu0 %vm926_vm1, %v970_v37  ;;  %v1197_v37 = vsel %vm1195_vm14, 1, %v3232_v36 }
 0x185   : > { %2963 = vmatprep.mubr.msk.bf16.mxu0 %vm3231_vm2, %v3230_v18  ;;  %v1201_v38 = vrot.slane %v1197_v37, %v3594_v35 }
 0x187   : > { %vm1202_vm0 = vcmp.eq.s32.totalorder %v1201_v38, 1 }
 0x188   : > { %vm1203_vm3 = vmand %vm1196_vm15, %vm1202_vm0 }
 0x189   : > { %v1204_v40 = vsel %vm1203_vm3, 0.0, %v3233_v39 }
 0x247   : > { %v1031_v41 = vpop.f32.mrb[0].mxu0 }
 0x248   : > { %v2937_v43 = vpop.f32.mrb[1].mxu0  ;;  %v1032_v49 = vadd.f32 %v2803_v46, %v1031_v41 }
 0x249   : > { %v3499_v44 = vpop.f32.mrb[2].mxu0 }
 0x24a   : > { %v2938_v45 = vpop.f32.mrb[3].mxu0  ;;  %v1166_v54 = vmul.f32 0.35355338, %v1032_v49  ;;  %v1035_v20 = vadd.f32 %v2803_v46, %v3499_v44 }
 0x24c   : > { %v1205_v60 = vmul.f32 %v3516_v57, %v1166_v54  ;;  %v1315_v10 = vmul.f32 %v3529_v7, %v1166_v54  ;;  %v1417_v14 = vmul.f32 %v3545_v13, %v1166_v54  ;;  %v1519_v19 = vmul.f32 %v3555_v16, %v1166_v54  ;;  %v1624_v54 = vld [vmem:[%s3865_s18 + $0x1] sm:$0x1] }
 0x24d   : > { %v1167_v23 = vmul.f32 0.35355338, %v1035_v20  ;;  %vm1625_vm5 = vcmp.gt.f32.partialorder %v1624_v54, 0.0 }
 0x24e   : > { %v1206_v6 = vpack.c.bf16 %v1205_v60, %v1205_v60  ;;  %v1316_v12 = vpack.c.bf16 %v1315_v10, %v1315_v10  ;;  %v1418_v15 = vpack.c.bf16 %v1417_v14, %v1417_v14  ;;  %v1520_v22 = vpack.c.bf16 %v1519_v19, %v1519_v19 }
 0x24f   : > { %v1095_v50 = vpop.f32.mrb[4].mxu0  ;;  %v1634_v25 = vmul.f32 %v3516_v57, %v1167_v23  ;;  %v1742_v27 = vmul.f32 %v3529_v7, %v1167_v23  ;;  %v1844_v29 = vmul.f32 %v3545_v13, %v1167_v23  ;;  %v1946_v31 = vmul.f32 %v3555_v16, %v1167_v23 }
 0x250   : > { %v1096_v51 = vadd.f32 %v2807_v48, %v1095_v50  ;;  %v2945_v52 = vpop.f32.mrb[5].mxu0 }
 0x251   : > { %v1098_v53 = vpop.f32.mrb[6].mxu0  ;;  %v1635_v26 = vpack.c.bf16 %v1634_v25, %v1634_v25  ;;  %v1743_v28 = vpack.c.bf16 %v1742_v27, %v1742_v27  ;;  %v1845_v30 = vpack.c.bf16 %v1844_v29, %v1844_v29  ;;  %v1947_v32 = vpack.c.bf16 %v1946_v31, %v1946_v31 }
 0x252   : > { %v1192_v55 = vpack.c.bf16 %v1096_v51, %v1096_v51  ;;  %v2946_v56 = vpop.f32.mrb[7].mxu0  ;;  %v1099_v17 = vadd.f32 %v2807_v48, %v1098_v53 }
 0x254   : > { %v1211_v58 = vsel %vm926_vm1, %v1192_v55, 0  ;;  %v1622_v21 = vpack.c.bf16 %v1099_v17, %v1099_v17 }
 0x255   : > { %2956 = vmatpush3.bf16.xpose.msra.mxu1 %v1211_v58 }
 0x256   : > { %2967 = vmatprep.subr.bf16.mxu1 %v3230_v18  ;;  %v1640_v24 = vsel %vm926_vm1, %v1622_v21, 0 }
 0x257   : > { %v1159_v61 = vpop.f32.mrb[8].mxu0 }
 0x258   : > { %v1160_v62 = vadd.f32 %v2811_v59, %v1159_v61  ;;  %v2953_v63 = vpop.f32.mrb[9].mxu0 }
 0x259   : > { %v1162_v0 = vpop.f32.mrb[10].mxu0 }
 0x25a   : > { %v1193_v1 = vpack.c.bf16 %v1160_v62, %v1160_v62  ;;  %v1163_v2 = vadd.f32 %v2811_v59, %v1162_v0  ;;  %v2954_v5 = vpop.f32.mrb[11].mxu0  ;;  %v1626_v59 = vsel %vm1625_vm5, 1, %v3232_v36 }
 0x25b   : > { %v1630_v63 = vrot.slane %v1626_v59, %v3594_v35 }
 0x25c   : > { %v3531_v8 = vsel %vm1269_vm7, %v1193_v1, 0  ;;  %v1623_v9 = vpack.c.bf16 %v1163_v2, %v1163_v2  ;;  %2958 = vmatmul.mubr.msk.bf16.vlgmr.msra.gmra.mrb[0].mxu1 %vm926_vm1, %v1206_v6 }
 0x25d   : > { %2962 = vmatpush3.bf16.msra.mxu0 %v3531_v8  ;;  %2968 = vmatpush3.bf16.xpose.msra.mxu1 %v1211_v58  ;;  %vm1631_vm6 = vcmp.eq.s32.totalorder %v1630_v63, 1 }
 0x25e   : > { %v3538_v11 = vsel %vm1269_vm7, %v1623_v9, 0  ;;  %2969 = vmatprep.mubr.msk.bf16.mxu1 %vm3231_vm2, %v3230_v18  ;;  %2979 = vmatprep.subr.bf16.mxu1 %v3230_v18  ;;  %vm1632_vm7 = vmand %vm1196_vm15, %vm1631_vm6 }
 0x25f   : > { %2973 = vmatprep.subr.bf16.mxu0 %v3230_v18  ;;  %v1633_v10 = vsel %vm1632_vm7, 0.0, %v3233_v39 }
 0x264   : > { %2970 = vmatmul.mubr.msk.bf16.vlgmr.msra.gmra.mrb[4].mxu1 %vm926_vm1, %v1316_v12 }
 0x265   : > { %2980 = vmatpush3.bf16.xpose.msra.mxu1 %v1211_v58  ;;  %2981 = vmatprep.mubr.msk.bf16.mxu1 %vm3231_vm2, %v3230_v18 }
 0x266   : > { %2991 = vmatprep.subr.bf16.mxu1 %v3230_v18 }
 0x26c   : > { %2982 = vmatmul.mubr.msk.bf16.vlgmr.msra.gmra.mrb[8].mxu1 %vm926_vm1, %v1418_v15 }
 0x26d   : > { %2992 = vmatpush3.bf16.xpose.msra.mxu1 %v1211_v58  ;;  %2993 = vmatprep.mubr.msk.bf16.mxu1 %vm3231_vm2, %v3230_v18 }
 0x26e   : > { %3003 = vmatprep.subr.bf16.mxu1 %v3230_v18 }
 0x274   : > { %2994 = vmatmul.mubr.msk.bf16.vlgmr.msra.gmra.mrb[12].mxu1 %vm926_vm1, %v1520_v22 }
 0x275   : > { %3004 = vmatpush3.bf16.xpose.msra.mxu1 %v1640_v24  ;;  %3005 = vmatprep.mubr.msk.bf16.mxu1 %vm3231_vm2, %v3230_v18 }
 0x276   : > { %3015 = vmatprep.subr.bf16.mxu1 %v3230_v18 }
 0x27c   : > { %3006 = vmatmul.mubr.msk.bf16.vlgmr.msra.gmra.mrb[16].mxu1 %vm926_vm1, %v1635_v26 }
 0x27d   : > { %3016 = vmatpush3.bf16.xpose.msra.mxu1 %v1640_v24  ;;  %3017 = vmatprep.mubr.msk.bf16.mxu1 %vm3231_vm2, %v3230_v18 }
 0x27e   : > { %3027 = vmatprep.subr.bf16.mxu1 %v3230_v18 }
 0x284   : > { %3018 = vmatmul.mubr.msk.bf16.vlgmr.msra.gmra.mrb[20].mxu1 %vm926_vm1, %v1743_v28 }
 0x285   : > { %3028 = vmatpush3.bf16.xpose.msra.mxu1 %v1640_v24  ;;  %3029 = vmatprep.mubr.msk.bf16.mxu1 %vm3231_vm2, %v3230_v18 }
 0x286   : > { %3039 = vmatprep.subr.bf16.mxu1 %v3230_v18 }
 0x28c   : > { %3030 = vmatmul.mubr.msk.bf16.vlgmr.msra.gmra.mrb[24].mxu1 %vm926_vm1, %v1845_v30 }
 0x28d   : > { %3040 = vmatpush3.bf16.xpose.msra.mxu1 %v1640_v24  ;;  %3041 = vmatprep.mubr.msk.bf16.mxu1 %vm3231_vm2, %v3230_v18 }
 0x28e   : > { %3051 = vmatprep.subr.bf16.mxu1 %v3230_v18 }
 0x294   : > { %3042 = vmatmul.mubr.msk.bf16.vlgmr.msra.gmra.mrb[28].mxu1 %vm926_vm1, %v1947_v32 }
 0x295   : > { %3055 = vmatprep.mubr.msk.bf16.mxu1 %vm3231_vm2, %v3230_v18 }
 0x32f   : > { %v1247_v41 = vpop.f32.mrb[0].mxu1 }
 0x330   : > { %v3602_v42 = vadd.f32 %v1247_v41, %v1204_v40  ;;  %v2959_v43 = vpop.f32.mrb[1].mxu1 }
 0x331   : > { %v1250_v44 = vpop.f32.mrb[2].mxu1 }
 0x332   : > { %v2960_v45 = vpop.f32.mrb[3].mxu1  ;;  %v1254_v46 = vsel %vm1253_vm4, %v3602_v42, -inf }
 0x333   : > { %1255 = vmax.xlane.f32.xlu0 %v1254_v46 }
 0x337   : > { %v1354_v48 = vpop.f32.mrb[4].mxu1 }
 0x338   : > { %v1355_v49 = vadd.f32 %v1354_v48, %v1204_v40  ;;  %v2971_v50 = vpop.f32.mrb[5].mxu1 }
 0x339   : > { %v1357_v51 = vpop.f32.mrb[6].mxu1 }
 0x33a   : > { %v2972_v52 = vpop.f32.mrb[7].mxu1  ;;  %v1360_v53 = vsel %vm1253_vm4, %v1355_v49, -inf }
 0x33b   : > { %1361 = vmax.xlane.f32.xlu1 %v1360_v53 }
 0x33f   : > { %v1456_v55 = vpop.f32.mrb[8].mxu1 }
 0x340   : > { %v1457_v56 = vadd.f32 %v1456_v55, %v1204_v40  ;;  %v2983_v58 = vpop.f32.mrb[9].mxu1 }
 0x341   : > { %v1459_v60 = vpop.f32.mrb[10].mxu1 }
 0x342   : > { %v2984_v61 = vpop.f32.mrb[11].mxu1  ;;  %v1462_v62 = vsel %vm1253_vm4, %v1457_v56, -inf }
 0x343   : > { %1463 = vmax.xlane.f32.xlu0 %v1462_v62 }
 0x347   : > { %v1558_v0 = vpop.f32.mrb[12].mxu1 }
 0x348   : > { %v1559_v1 = vadd.f32 %v1558_v0, %v1204_v40  ;;  %v2995_v2 = vpop.f32.mrb[13].mxu1 }
 0x349   : > { %v1561_v5 = vpop.f32.mrb[14].mxu1 }
 0x34a   : > { %v2996_v6 = vpop.f32.mrb[15].mxu1  ;;  %v1564_v9 = vsel %vm1253_vm4, %v1559_v1, -inf }
 0x34b   : > { %1565 = vmax.xlane.f32.xlu1 %v1564_v9 }
 0x34f   : > { %v1676_v12 = vpop.f32.mrb[16].mxu1 }
 0x350   : > { %v1677_v14 = vadd.f32 %v1676_v12, %v1633_v10  ;;  %v3007_v15 = vpop.f32.mrb[17].mxu1 }
 0x351   : > { %v1679_v17 = vpop.f32.mrb[18].mxu1 }
 0x352   : > { %v3008_v19 = vpop.f32.mrb[19].mxu1  ;;  %v1682_v20 = vsel %vm1253_vm4, %v1677_v14, -inf }
 0x353   : > { %1683 = vmax.xlane.f32.xlu0 %v1682_v20 }
 0x357   : > { %v1781_v21 = vpop.f32.mrb[20].mxu1 }
 0x358   : > { %v1782_v22 = vadd.f32 %v1781_v21, %v1633_v10  ;;  %v3019_v23 = vpop.f32.mrb[21].mxu1 }
 0x359   : > { %v1784_v24 = vpop.f32.mrb[22].mxu1 }
 0x35a   : > { %v3020_v25 = vpop.f32.mrb[23].mxu1  ;;  %v1787_v26 = vsel %vm1253_vm4, %v1782_v22, -inf }
 0x35b   : > { %1788 = vmax.xlane.f32.xlu1 %v1787_v26 }
 0x35f   : > { %v1883_v27 = vpop.f32.mrb[24].mxu1 }
 0x360   : > { %v1884_v28 = vadd.f32 %v1883_v27, %v1633_v10  ;;  %v3031_v29 = vpop.f32.mrb[25].mxu1 }
 0x361   : > { %v1886_v30 = vpop.f32.mrb[26].mxu1 }
 0x362   : > { %v3032_v31 = vpop.f32.mrb[27].mxu1  ;;  %v1889_v32 = vsel %vm1253_vm4, %v1884_v28, -inf }
 0x363   : > { %1890 = vmax.xlane.f32.xlu0 %v1889_v32 }
 0x367   : > { %v1985_v33 = vpop.f32.mrb[28].mxu1 }
 0x368   : > { %v1986_v36 = vadd.f32 %v1985_v33, %v1633_v10  ;;  %v3043_v37 = vpop.f32.mrb[29].mxu1 }
 0x369   : > { %v1988_v38 = vpop.f32.mrb[30].mxu1 }
 0x36a   : > { %v3044_v39 = vpop.f32.mrb[31].mxu1  ;;  %v1991_v40 = vsel %vm1253_vm4, %v1986_v36, -inf }
 0x36b   : > { %1992 = vmax.xlane.f32.xlu1 %v1991_v40 }
 0x3c0   : > { %v1256_v41 = vpop.xlane.xlu0 %1255 }
 0x3c1   : > { %v1257_v43 = vsub.f32 %v3602_v42, %v1256_v41 }
 0x3c3   : > { %v1258_v44 = vmul.f32 1.442695, %v1257_v43 }
 0x3c5   : > { %3147 = vpow2.f32 %v1258_v44 }
 0x3c8   : > { %v1362_v45 = vpop.xlane.xlu1 %1361 }
 0x3c9   : > { %v1363_v46 = vsub.f32 %v1355_v49, %v1362_v45 }
 0x3cb   : > { %v1364_v48 = vmul.f32 1.442695, %v1363_v46 }
 0x3cd   : > { %3149 = vpow2.f32 %v1364_v48 }
 0x3cf   : > { %v3148_v50 = vpop.eup %3147 }
 0x3d0   : > { %v1464_v51 = vpop.xlane.xlu0 %1463  ;;  %v1260_v52 = vsel %vm1253_vm4, %v3148_v50, 0.0 }
 0x3d1   : > { %v1465_v53 = vsub.f32 %v1457_v56, %v1464_v51  ;;  %1261 = vadd.xlane.f32.xlu0 %v1260_v52 }
 0x3d3   : > { %v1466_v54 = vmul.f32 1.442695, %v1465_v53 }
 0x3d5   : > { %3151 = vpow2.f32 %v1466_v54 }
 0x3d7   : > { %v3150_v55 = vpop.eup %3149 }
 0x3d8   : > { %v1566_v58 = vpop.xlane.xlu1 %1565  ;;  %v1366_v59 = vsel %vm1253_vm4, %v3150_v55, 0.0 }
 0x3d9   : > { %v1567_v60 = vsub.f32 %v1559_v1, %v1566_v58  ;;  %1367 = vadd.xlane.f32.xlu1 %v1366_v59 }
 0x3db   : > { %v1568_v42 = vmul.f32 1.442695, %v1567_v60 }
 0x3dd   : > { %3153 = vpow2.f32 %v1568_v42 }
 0x3df   : > { %v3152_v61 = vpop.eup %3151 }
 0x3e0   : > { %v1684_v49 = vpop.xlane.xlu0 %1683  ;;  %v1468_v62 = vsel %vm1253_vm4, %v3152_v61, 0.0 }
 0x3e1   : > { %v1685_v63 = vsub.f32 %v1677_v14, %v1684_v49  ;;  %1469 = vadd.xlane.f32.xlu0 %v1468_v62 }
 0x3e3   : > { %v1686_v0 = vmul.f32 1.442695, %v1685_v63  ;;  %v3131_v63 = vld [vmem:[%s3410_s7] sm:$0xff]  }
 0x3e4   : > { %3052 = vmatpush3.bf16.msra.mxu1 %v3131_v63 }
 0x3e5   : > { %3155 = vpow2.f32 %v1686_v0  ;;  %v3132_v0 = vld [vmem:[%s3410_s7 + $0x8] sm:$0xff]   ;;  %3053 = vmatprep.subr.bf16.mxu1 %v3230_v18  ;;  %s3869_s7 = sld [smem:[#allocation21_spill]] (!%p2854_p5) }
 0x3e7   : > { %v3154_v56 = vpop.eup %3153 }
 0x3e8   : > { %v1789_v2 = vpop.xlane.xlu1 %1788  ;;  %v1570_v5 = vsel %vm1253_vm4, %v3154_v56, 0.0  ;;  %3054 = vmatpush3.bf16.msra.mxu1 %v3132_v0 }
 0x3e9   : > { %v1790_v6 = vsub.f32 %v1782_v22, %v1789_v2  ;;  %1571 = vadd.xlane.f32.xlu1 %v1570_v5  ;;  %3067 = vmatprep.subr.bf16.mxu1 %v3230_v18 }
 0x3eb   : > { %v1791_v9 = vmul.f32 1.442695, %v1790_v6 }
 0x3ed   : > { %3157 = vpow2.f32 %v1791_v9 }
 0x3ef   : > { %v3156_v1 = vpop.eup %3155 }
 0x3f0   : > { %v1891_v10 = vpop.xlane.xlu0 %1890  ;;  %v1688_v12 = vsel %vm1253_vm4, %v3156_v1, 0.0 }
 0x3f1   : > { %v1892_v15 = vsub.f32 %v1884_v28, %v1891_v10  ;;  %1689 = vadd.xlane.f32.xlu0 %v1688_v12 }
 0x3f3   : > { %v1893_v17 = vmul.f32 1.442695, %v1892_v15 }
 0x3f5   : > { %3159 = vpow2.f32 %v1893_v17 }
 0x3f7   : > { %v3626_v14 = vpop.eup %3157 }
 0x3f8   : > { %v1993_v19 = vpop.xlane.xlu1 %1992  ;;  %v1793_v20 = vsel %vm1253_vm4, %v3626_v14, 0.0 }
 0x3f9   : > { %v1994_v21 = vsub.f32 %v1986_v36, %v1993_v19  ;;  %1794 = vadd.xlane.f32.xlu1 %v1793_v20 }
 0x3fb   : > { %v1995_v22 = vmul.f32 1.442695, %v1994_v21 }
 0x3fd   : > { %3161 = vpow2.f32 %v1995_v22 }
 0x3ff   : > { %v3630_v23 = vpop.eup %3159 }
 0x400   : > { %v1895_v24 = vsel %vm1253_vm4, %v3630_v23, 0.0 }
 0x401   : > { %1896 = vadd.xlane.f32.xlu0 %v1895_v24 }
 0x407   : > { %v3634_v25 = vpop.eup %3161 }
 0x408   : > { %v1997_v26 = vsel %vm1253_vm4, %v3634_v25, 0.0 }
 0x409   : > { %1998 = vadd.xlane.f32.xlu1 %v1997_v26 }
 0x45e   : > { %v1262_v27 = vpop.xlane.xlu0 %1261 }
 0x45f   : > { %3163 = vrcp.f32 %v1262_v27 }
 0x466   : > { %v1368_v28 = vpop.xlane.xlu1 %1367 }
 0x467   : > { %3165 = vrcp.f32 %v1368_v28 }
 0x469   : > { %v3164_v29 = vpop.eup %3163 }
 0x46a   : > { %v1264_v30 = vmul.f32 %v3164_v29, %v3148_v50 }
 0x46c   : > { %v1265_v31 = vpack.c.bf16 %v1264_v30, %v1264_v30 }
 0x46e   : > { %v1470_v32 = vpop.xlane.xlu0 %1469  ;;  %2964 = vmatmul.mubr.msk.bf16.vlgmr.msra.gmra.mrb[12].mxu0 %vm1253_vm4, %v1265_v31 }
 0x46f   : > { %3167 = vrcp.f32 %v1470_v32  ;;  %2974 = vmatpush3.bf16.msra.mxu0 %v3531_v8  ;;  %2975 = vmatprep.mubr.msk.bf16.mxu0 %vm3231_vm2, %v3230_v18 }
 0x470   : > { %2985 = vmatprep.subr.bf16.mxu0 %v3230_v18 }
 0x471   : > { %v3166_v33 = vpop.eup %3165 }
 0x472   : > { %v1370_v36 = vmul.f32 %v3166_v33, %v3150_v55 }
 0x474   : > { %v1371_v37 = vpack.c.bf16 %v1370_v36, %v1370_v36 }
 0x476   : > { %v1572_v38 = vpop.xlane.xlu1 %1571  ;;  %2976 = vmatmul.mubr.msk.bf16.vlgmr.msra.gmra.mrb[16].mxu0 %vm1253_vm4, %v1371_v37 }
 0x477   : > { %3169 = vrcp.f32 %v1572_v38  ;;  %2986 = vmatpush3.bf16.msra.mxu0 %v3531_v8  ;;  %2987 = vmatprep.mubr.msk.bf16.mxu0 %vm3231_vm2, %v3230_v18 }
 0x478   : > { %2997 = vmatprep.subr.bf16.mxu0 %v3230_v18 }
 0x479   : > { %v3168_v39 = vpop.eup %3167 }
 0x47a   : > { %v1472_v40 = vmul.f32 %v3168_v39, %v3152_v61 }
 0x47c   : > { %v1473_v41 = vpack.c.bf16 %v1472_v40, %v1472_v40 }
 0x47e   : > { %v1690_v43 = vpop.xlane.xlu0 %1689  ;;  %2988 = vmatmul.mubr.msk.bf16.vlgmr.msra.gmra.mrb[20].mxu0 %vm1253_vm4, %v1473_v41 }
 0x47f   : > { %3171 = vrcp.f32 %v1690_v43  ;;  %2998 = vmatpush3.bf16.msra.mxu0 %v3531_v8  ;;  %2999 = vmatprep.mubr.msk.bf16.mxu0 %vm3231_vm2, %v3230_v18 }
 0x480   : > { %3009 = vmatprep.subr.bf16.mxu0 %v3230_v18 }
 0x481   : > { %v3170_v44 = vpop.eup %3169 }
 0x482   : > { %v1574_v45 = vmul.f32 %v3170_v44, %v3154_v56 }
 0x484   : > { %v1575_v46 = vpack.c.bf16 %v1574_v45, %v1574_v45 }
 0x486   : > { %v1795_v48 = vpop.xlane.xlu1 %1794  ;;  %3000 = vmatmul.mubr.msk.bf16.vlgmr.msra.gmra.mrb[24].mxu0 %vm1253_vm4, %v1575_v46 }
 0x487   : > { %3173 = vrcp.f32 %v1795_v48  ;;  %3010 = vmatpush3.bf16.msra.mxu0 %v3538_v11  ;;  %3011 = vmatprep.mubr.msk.bf16.mxu0 %vm3231_vm2, %v3230_v18 }
 0x488   : > { %3021 = vmatprep.subr.bf16.mxu0 %v3230_v18 }
 0x489   : > { %v3172_v8 = vpop.eup %3171 }
 0x48a   : > { %v1692_v50 = vmul.f32 %v3172_v8, %v3156_v1 }
 0x48c   : > { %v1693_v51 = vpack.c.bf16 %v1692_v50, %v1692_v50 }
 0x48e   : > { %v1897_v52 = vpop.xlane.xlu0 %1896  ;;  %3012 = vmatmul.mubr.msk.bf16.vlgmr.msra.gmra.mrb[28].mxu0 %vm1253_vm4, %v1693_v51 }
 0x48f   : > { %3175 = vrcp.f32 %v1897_v52  ;;  %3022 = vmatpush3.bf16.msra.mxu0 %v3538_v11  ;;  %3023 = vmatprep.mubr.msk.bf16.mxu0 %vm3231_vm2, %v3230_v18 }
 0x490   : > { %3033 = vmatprep.subr.bf16.mxu0 %v3230_v18 }
 0x491   : > { %v3174_v53 = vpop.eup %3173 }
 0x492   : > { %v1797_v54 = vmul.f32 %v3174_v53, %v3626_v14 }
 0x494   : > { %v1798_v55 = vpack.c.bf16 %v1797_v54, %v1797_v54 }
 0x496   : > { %v1999_v58 = vpop.xlane.xlu1 %1998  ;;  %3024 = vmatmul.mubr.msk.bf16.vlgmr.msra.gmra.mrb[32].mxu0 %vm1253_vm4, %v1798_v55 }
 0x497   : > { %3177 = vrcp.f32 %v1999_v58  ;;  %3034 = vmatpush3.bf16.msra.mxu0 %v3538_v11  ;;  %3035 = vmatprep.mubr.msk.bf16.mxu0 %vm3231_vm2, %v3230_v18 }
 0x498   : > { %3045 = vmatprep.subr.bf16.mxu0 %v3230_v18 }
 0x499   : > { %v3176_v59 = vpop.eup %3175 }
 0x49a   : > { %v1899_v60 = vmul.f32 %v3176_v59, %v3630_v23 }
 0x49c   : > { %v1900_v42 = vpack.c.bf16 %v1899_v60, %v1899_v60 }
 0x49e   : > { %3036 = vmatmul.mubr.msk.bf16.vlgmr.msra.gmra.mrb[36].mxu0 %vm1253_vm4, %v1900_v42 }
 0x49f   : > { %3046 = vmatpush3.bf16.msra.mxu0 %v3538_v11  ;;  %3047 = vmatprep.mubr.msk.bf16.mxu0 %vm3231_vm2, %v3230_v18 }
 0x4a0   : > { %3059 = vmatprep.subr.bf16.mxu0 %v3230_v18 }
 0x4a1   : > { %v3178_v61 = vpop.eup %3177 }
 0x4a2   : > { %v2001_v49 = vmul.f32 %v3178_v61, %v3634_v25 }
 0x4a4   : > { %v2002_v62 = vpack.c.bf16 %v2001_v49, %v2001_v49 }
 0x4a6   : > { %3048 = vmatmul.mubr.msk.bf16.vlgmr.msra.gmra.mrb[40].mxu0 %vm1253_vm4, %v2002_v62 }
 0x4a7   : > { %3063 = vmatprep.mubr.msk.bf16.mxu0 %vm3231_vm2, %v3230_v18 }
 0x541   : > { %v1307_v11 = vpop.f32.mrb[12].mxu0 }
 0x542   : > { %v2965_v56 = vpop.f32.mrb[13].mxu0  ;;  %v1313_v9 = vmul.f32 %v3516_v57, %v1307_v11 }
 0x543   : > { %v1310_v2 = vpop.f32.mrb[14].mxu0 }
 0x544   : > { %v2966_v5 = vpop.f32.mrb[15].mxu0 }
 0x549   : > { %v1409_v6 = vpop.f32.mrb[16].mxu0 }
 0x54a   : > { %v1415_v1 = vmul.f32 %v3529_v7, %v1409_v6  ;;  %v2977_v10 = vpop.f32.mrb[17].mxu0 }
 0x54b   : > { %v1412_v12 = vpop.f32.mrb[18].mxu0 }
 0x54c   : > { %v1416_v15 = vadd.f32 %v1415_v1, %v1313_v9  ;;  %v2978_v17 = vpop.f32.mrb[19].mxu0 }
 0x54d   : > { %v3133_v17 = vld [vmem:[%s3427_s27] sm:$0xff]  }
 0x54e   : > { %3060 = vmatpush3.bf16.msra.mxu0 %v3133_v17 }
 0x54f   : > { %3061 = vmatprep.subr.bf16.mxu0 %v3230_v18 }
 0x551   : > { %v1511_v14 = vpop.f32.mrb[20].mxu0 }
 0x552   : > { %v1517_v19 = vmul.f32 %v3545_v13, %v1511_v14  ;;  %v2989_v20 = vpop.f32.mrb[21].mxu0  ;;  %v3134_v14 = vld [vmem:[%s3427_s27 + $0x8] sm:$0xff]  }
 0x553   : > { %v1514_v21 = vpop.f32.mrb[22].mxu0  ;;  %3062 = vmatpush3.bf16.msra.mxu0 %v3134_v14 }
 0x554   : > { %v1518_v22 = vadd.f32 %v1517_v19, %v1416_v15  ;;  %v2990_v23 = vpop.f32.mrb[23].mxu0 }
 0x559   : > { %v1613_v24 = vpop.f32.mrb[24].mxu0 }
 0x55a   : > { %v1619_v25 = vmul.f32 %v3555_v16, %v1613_v24  ;;  %v3001_v26 = vpop.f32.mrb[25].mxu0 }
 0x55b   : > { %v1616_v27 = vpop.f32.mrb[26].mxu0  ;;  %v2839_v26 = vld [vmem:[%s892_s5] ss:$0 sm:$0xff] }
 0x55c   : > { %v1620_v28 = vadd.f32 %v1619_v25, %v1518_v22  ;;  %v3002_v29 = vpop.f32.mrb[27].mxu0 }
 0x55e   : > { %1621 = vst.msk [vmem:[#allocation3] sm:$0xff] %vm926_vm1, %v1620_v28 }
 0x561   : > { %v1734_v30 = vpop.f32.mrb[28].mxu0 }
 0x562   : > { %v3013_v31 = vpop.f32.mrb[29].mxu0  ;;  %v1740_v37 = vmul.f32 %v3516_v57, %v1734_v30 }
 0x563   : > { %v1737_v32 = vpop.f32.mrb[30].mxu0  ;;  %v2840_v31 = vld [vmem:[%s895_s6] ss:$0 sm:$0xff] }
 0x564   : > { %v3014_v33 = vpop.f32.mrb[31].mxu0 }
 0x569   : > { %v1836_v36 = vpop.f32.mrb[32].mxu0 }
 0x56a   : > { %v1842_v38 = vmul.f32 %v3529_v7, %v1836_v36  ;;  %v3025_v39 = vpop.f32.mrb[33].mxu0  ;;  %v2049_v7 = vld [vmem:[#allocation3] sm:$0xff] }
 0x56b   : > { %v1839_v40 = vpop.f32.mrb[34].mxu0  ;;  %v3136_v39 = vld [vmem:[%s3437_s22 + $0x8] sm:$0xff]  }
 0x56c   : > { %v1843_v41 = vadd.f32 %v1842_v38, %v1740_v37  ;;  %v3026_v43 = vpop.f32.mrb[35].mxu0  ;;  %v3135_v38 = vld [vmem:[%s3437_s22] sm:$0xff]   ;;  %v3137_v40 = vld [vmem:[%s3437_s22 + $0x10] sm:$0xff]  }
 0x56d   : > { %v3139_v43 = vld [vmem:[%s3437_s22 + $0x20] sm:$0xff]  }
 0x571   : > { %v1938_v44 = vpop.f32.mrb[36].mxu0 }
 0x572   : > { %v1944_v45 = vmul.f32 %v3545_v13, %v1938_v44  ;;  %v3037_v46 = vpop.f32.mrb[37].mxu0  ;;  %v2835_v13 = vld [vmem:[%s3866_s29] ss:$0 sm:$0xff]  ;;  %v3140_v44 = vld [vmem:[%s3437_s22 + $0x28] sm:$0xff]  }
 0x573   : > { %v1941_v48 = vpop.f32.mrb[38].mxu0  ;;  %v3142_v46 = vld [vmem:[%s3437_s22 + $0x38] sm:$0xff]  }
 0x574   : > { %v1945_v8 = vadd.f32 %v1944_v45, %v1843_v41  ;;  %v3038_v50 = vpop.f32.mrb[39].mxu0  ;;  %v3138_v41 = vld [vmem:[%s3437_s22 + $0x18] sm:$0xff]   ;;  %v3141_v45 = vld [vmem:[%s3437_s22 + $0x30] sm:$0xff]   ;;  %v2841_v48 = vld [vmem:[%s903_s28] ss:$0 sm:$0xff] }
 0x579   : > { %v2040_v51 = vpop.f32.mrb[40].mxu0 }
 0x57a   : > { %v2046_v52 = vmul.f32 %v3555_v16, %v2040_v51  ;;  %v3049_v53 = vpop.f32.mrb[41].mxu0 }
 0x57b   : > { %v2043_v54 = vpop.f32.mrb[42].mxu0 }
 0x57c   : > { %v2047_v57 = vadd.f32 %v2046_v52, %v1945_v8  ;;  %v3050_v55 = vpop.f32.mrb[43].mxu0 }
 0x57e   : > { %2048 = vst.msk [vmem:[#allocation3 + $0x8] sm:$0xff] %vm926_vm1, %v2047_v57 }
 0x585   : > { %v2050_v58 = vld [vmem:[#allocation3 + $0x8] sm:$0xff] }
 0x586   : > { %v2051_v59 = vpack.c.bf16 %v2050_v58, %v2049_v7 }
 0x588   : > { %3056 = vmatmul.mubr.msk.bf16.vlgmr.msra.gmra.mrb[32].mxu1 %vm926_vm1, %v2051_v59 }
 0x589   : > { %3083 = vmatprep.mubr.msk.bf16.mxu1 %vm3231_vm2, %v3230_v18  ;;  %3068 = vmatpush3.bf16.msra.mxu1 %v3135_v38  ;;  %vm3235_vm2 = vmmov (!%p2854_p5), 0  }
 0x58a   : > { %3069 = vmatprep.subr.bf16.mxu1 %v3230_v18 }
 0x58d   : > { %3070 = vmatpush3.bf16.msra.mxu1 %v3136_v39 }
 0x58e   : > { %3071 = vmatprep.subr.bf16.mxu1 %v3230_v18 }
 0x591   : > { %3072 = vmatpush3.bf16.msra.mxu1 %v3137_v40 }
 0x592   : > { %3073 = vmatprep.subr.bf16.mxu1 %v3230_v18 }
 0x595   : > { %3074 = vmatpush3.bf16.msra.mxu1 %v3138_v41 }
 0x596   : > { %3075 = vmatprep.subr.bf16.mxu1 %v3230_v18 }
 0x599   : > { %3076 = vmatpush3.bf16.msra.mxu1 %v3139_v43  ;;  %v2420_v43 = vadd.s32 (!%p2854_p5), 1, %v3591_v34 }
 0x59a   : > { %3077 = vmatprep.subr.bf16.mxu1 %v3230_v18 }
 0x59d   : > { %3078 = vmatpush3.bf16.msra.mxu1 %v3140_v44 }
 0x59e   : > { %3079 = vmatprep.subr.bf16.mxu1 %v3230_v18 }
 0x5a1   : > { %3080 = vmatpush3.bf16.msra.mxu1 %v3141_v45 }
 0x5a2   : > { %3081 = vmatprep.subr.bf16.mxu1 %v3230_v18 }
 0x5a5   : > { %3082 = vmatpush3.bf16.msra.mxu1 %v3142_v46  ;;  %v2855_v46 = vld [vmem:[%s3867_s1] ss:$0 sm:$0xff] (!%p2854_p5) }
 0x65b   : > { %v2112_v16 = vpop.f32.mrb[32].mxu1 }
 0x65c   : > { %v2113_v60 = vadd.f32 %v2835_v13, %v2112_v16  ;;  %v3057_v42 = vpop.f32.mrb[33].mxu1 }
 0x65d   : > { %v2115_v61 = vpop.f32.mrb[34].mxu1 }
 0x65e   : > { %v3702_v49 = vadd.f32 %v2113_v60, %v3450_v3  ;;  %v2116_v62 = vadd.f32 %v2835_v13, %v2115_v61  ;;  %v3058_v63 = vpop.f32.mrb[35].mxu1 }
 0x660   : > { %v3705_v0 = vadd.f32 %v2116_v62, %v3452_v4  ;;  %v2123_v11 = vsel %vm926_vm1, %v3702_v49, 0.0 }
 0x661   : > { %2124 = vadd.xlane.f32.xlu0 %v2123_v11 }
 0x662   : > { %v2126_v56 = vsel %vm926_vm1, %v3705_v0, 0.0 }
 0x663   : > { %2127 = vadd.xlane.f32.xlu1 %v2126_v56 }
 0x6ee   : > { %v2125_v2 = vpop.xlane.xlu0 %2124 }
 0x6ef   : > { %v2129_v5 = vmul.f32 0.03125, %v2125_v2 }
 0x6f0   : > { %v2128_v6 = vpop.xlane.xlu1 %2127 }
 0x6f1   : > { %v2131_v3 = vsub.f32 %v3702_v49, %v2129_v5  ;;  %v2130_v9 = vmul.f32 0.03125, %v2128_v6 }
 0x6f3   : > { %v2132_v1 = vsub.f32 %v3705_v0, %v2130_v9  ;;  %v2133_v4 = vmul.f32 %v2131_v3, %v2131_v3  ;;  %v2845_v9 = vld [vmem:[%s911_s24] ss:$0 sm:$0xff] }
 0x6f5   : > { %v2135_v10 = vsel %vm926_vm1, %v2133_v4, 0.0  ;;  %v2134_v12 = vmul.f32 %v2132_v1, %v2132_v1 }
 0x6f6   : > { %2136 = vadd.xlane.f32.xlu0 %v2135_v10 }
 0x6f7   : > { %v2138_v15 = vsel %vm926_vm1, %v2134_v12, 0.0 }
 0x6f8   : > { %2139 = vadd.xlane.f32.xlu1 %v2138_v15 }
 0x783   : > { %v2137_v19 = vpop.xlane.xlu0 %2136 }
 0x784   : > { %v2141_v20 = vmul.f32 0.03125, %v2137_v19 }
 0x785   : > { %v2140_v21 = vpop.xlane.xlu1 %2139 }
 0x786   : > { %v2143_v22 = vadd.f32 1e-05, %v2141_v20  ;;  %v2142_v23 = vmul.f32 0.03125, %v2140_v21 }
 0x788   : > { %3179 = vrsqrt.f32 %v2143_v22  ;;  %v2144_v24 = vadd.f32 1e-05, %v2142_v23 }
 0x78a   : > { %3181 = vrsqrt.f32 %v2144_v24 }
 0x792   : > { %v3180_v25 = vpop.eup %3179 }
 0x793   : > { %v2147_v27 = vmul.f32 %v3180_v25, %v2131_v3 }
 0x794   : > { %v3182_v28 = vpop.eup %3181 }
 0x795   : > { %v2155_v29 = vmul.f32 %v2839_v26, %v2147_v27  ;;  %v2148_v30 = vmul.f32 %v3182_v28, %v2132_v1 }
 0x797   : > { %v2156_v32 = vmul.f32 %v2839_v26, %v2148_v30  ;;  %v2163_v33 = vadd.f32 %v2840_v31, %v2155_v29 }
 0x799   : > { %v2164_v36 = vadd.f32 %v2840_v31, %v2156_v32  ;;  %v3234_v32 = vmov (!%p2854_p5), 0.0|0.0  }
 0x79a   : > { %3099 = vmatprep.subr.bf16.mxu0 (!%p2854_p5), %v3234_v32 }
 0x79b   : > { %v2165_v37 = vpack.c.bf16 %v2164_v36, %v2163_v33  ;;  %v3236_v33 = vmov (!%p2854_p5), 0.0  }
 0x79c   : > { %3094 = vmatprep.subr.mxu1 (!%p2854_p5), %v3236_v33 }
 0x79d   : > { %3064 = vmatmul.mubr.msk.bf16.vlgmr.msra.gmra.mrb[44].mxu0 %vm926_vm1, %v2165_v37 }
 0x79e   : > { %3091 = vmatprep.mubr.msk.f32.mxu0 (!%p2854_p5), %vm3235_vm2, %v3236_v33 }
 0x870   : > { %v2226_v8 = vpop.f32.mrb[44].mxu0 }
 0x871   : > { %v2227_v50 = vadd.f32 %v2841_v48, %v2226_v8  ;;  %v3065_v51 = vpop.f32.mrb[45].mxu0  ;;  %v2421_v8 = vmul.u32 (!%p2854_p5), 8, %v2420_v43 }
 0x872   : > { %v2229_v52 = vpop.f32.mrb[46].mxu0 }
 0x873   : > { %v2235_v53 = vmul.f32 0.044715, %v2227_v50  ;;  %v2230_v54 = vadd.f32 %v2841_v48, %v2229_v52  ;;  %v3066_v57 = vpop.f32.mrb[47].mxu0  ;;  %v2233_v11 = vmul.f32 0.5, %v2227_v50  ;;  %v2418_v48 = vmul.u32 (!%p2854_p5), 8, %v3591_v34 }
 0x874   : > { %vm2422_vm9 = vcmp.lt.s32.totalorder (!%p2854_p5), %v3507_v47, %v2421_v8  ;;  %v2500_v34 = vld [vmem:[#allocation4] sm:$0x1] (!%p2854_p5) }
 0x875   : > { %v2237_v55 = vmul.f32 %v2235_v53, %v2227_v50  ;;  %v2236_v7 = vmul.f32 0.044715, %v2230_v54  ;;  %v2234_v56 = vmul.f32 0.5, %v2230_v54  ;;  %v2856_v53 = vld [vmem:[%s3868_s26] ss:$0 sm:$0xff] (!%p2854_p5)  ;;  %vm2419_vm8 = vcmp.ge.s32.totalorder (!%p2854_p5), %v3507_v47, %v2418_v48 }
 0x876   : > { %vm2423_vm10 = vmand (!%p2854_p5), %vm2419_vm8, %vm2422_vm9  ;;  %v2499_v47 = vld [vmem:[%s3869_s7] sm:$0x1] (!%p2854_p5) }
 0x877   : > { %v2239_v58 = vmul.f32 %v2237_v55, %v2227_v50  ;;  %v2238_v59 = vmul.f32 %v2236_v7, %v2230_v54 }
 0x879   : > { %v2241_v13 = vadd.f32 %v2239_v58, %v2227_v50  ;;  %v2240_v16 = vmul.f32 %v2238_v59, %v2230_v54  ;;  %v2424_v58 = vsel (!%p2854_p5), %vm2423_vm10, 0.125, %v3236_v33  ;;  %v3237_v59 = vmov (!%p2854_p5), 0  }
 0x87a   : > { %3187 = vset.pattern.permute.xlu0 (!%p2854_p5), %v3237_v59 }
 0x87b   : > { %v2243_v18 = vmul.f32 0.7978846, %v2241_v13  ;;  %v2242_v60 = vadd.f32 %v2240_v16, %v2230_v54 }
 0x87d   : > { %3183 = vtanh.f32 %v2243_v18  ;;  %v2244_v42 = vmul.f32 0.7978846, %v2242_v60 }
 0x87f   : > { %3185 = vtanh.f32 %v2244_v42 }
 0x887   : > { %v3184_v61 = vpop.eup %3183 }
 0x888   : > { %v2247_v62 = vadd.f32 1.0, %v3184_v61 }
 0x889   : > { %v3186_v63 = vpop.eup %3185 }
 0x88a   : > { %v2248_v2 = vadd.f32 1.0, %v3186_v63  ;;  %v2249_v5 = vmul.f32 %v2247_v62, %v2233_v11 }
 0x88c   : > { %v2250_v6 = vmul.f32 %v2248_v2, %v2234_v56 }
 0x88e   : > { %v2251_v3 = vpack.c.bf16 %v2250_v6, %v2249_v5 }
 0x890   : > { %3084 = vmatmul.mubr.bf16.vlgmr.msra.gmra.mrb[36].mxu1 %v2251_v3 }
 0x891   : > { %3096 = vmatprep.mubr.msk.f32.mxu1 (!%p2854_p5), %vm3235_vm2, %v3236_v33 }
 0x963   : > { %v2357_v1 = vpop.f32.mrb[36].mxu1 }
 0x964   : > { %v2358_v4 = vadd.f32 %v2845_v9, %v2357_v1  ;;  %v3085_v10 = vpop.f32.mrb[37].mxu1  ;;  %2371 = sbr.rel (%p2854_p5) target bundleno = 3168 (0xc60), region = 116 }
 0x965   : > { %v2360_v12 = vpop.f32.mrb[38].mxu1 }
 0x966   : > { %v2364_v15 = vadd.f32 %v2358_v4, %v3702_v49  ;;  %v2361_v17 = vadd.f32 %v2845_v9, %v2360_v12  ;;  %v3086_v14 = vpop.f32.mrb[39].mxu1 }
 0x968   : > { %2366 = vst.msk [vmem:[#allocation2] sm:$0xff] %vm926_vm1, %v2364_v15  ;;  %v2365_v19 = vadd.f32 %v2361_v17, %v3705_v0 }
 0x96a   : > { %2367 = vst.msk [vmem:[#allocation2 + $0x8] sm:$0xff] %vm926_vm1, %v2365_v19 }
 0x96f   : > { %v2372_v20 = vld [vmem:[#allocation2] sm:$0xff] }
 0x970   : > { %v2376_v22 = vsel %vm926_vm1, %v2372_v20, 0.0 }
 0x971   : > { %v2373_v21 = vld [vmem:[#allocation2 + $0x8] sm:$0xff]  ;;  %2377 = vadd.xlane.f32.xlu0 %v2376_v22 }
 0x972   : > { %v2379_v23 = vsel %vm926_vm1, %v2373_v21, 0.0 }
 0x975   : > { %2380 = vadd.xlane.f32.xlu0 %v2379_v23 }
 0x98b   : > { %2503 = vperm.xlu0 %3187, %v2500_v34  }
 0x9fe   : > { %v2378_v49 = vpop.xlane.xlu0 %2377 }
 0x9ff   : > { %v2382_v24 = vmul.f32 0.03125, %v2378_v49 }
 0xa01   : > { %v2384_v25 = vsub.f32 %v2372_v20, %v2382_v24 }
 0xa02   : > { %v2381_v26 = vpop.xlane.xlu0 %2380 }
 0xa03   : > { %v2383_v27 = vmul.f32 0.03125, %v2381_v26  ;;  %v2386_v28 = vmul.f32 %v2384_v25, %v2384_v25 }
 0xa05   : > { %v2385_v0 = vsub.f32 %v2373_v21, %v2383_v27  ;;  %v2388_v29 = vsel %vm926_vm1, %v2386_v28, 0.0 }
 0xa06   : > { %2389 = vadd.xlane.f32.xlu1 %v2388_v29 }
 0xa07   : > { %v2387_v30 = vmul.f32 %v2385_v0, %v2385_v0 }
 0xa09   : > { %v2391_v31 = vsel %vm926_vm1, %v2387_v30, 0.0 }
 0xa0a   : > { %2392 = vadd.xlane.f32.xlu1 %v2391_v31  ;;  %v2504_v18 = vpop.permute.xlu0 %2503 }
 0xa0b   : > { %v2509_v60 = vrot.slane %v2504_v18, %v3594_v35 }
 0xa93   : > { %v2390_v36 = vpop.xlane.xlu1 %2389 }
 0xa94   : > { %v2394_v37 = vmul.f32 0.03125, %v2390_v36 }
 0xa96   : > { %v2396_v38 = vadd.f32 1e-05, %v2394_v37 }
 0xa97   : > { %v2393_v39 = vpop.xlane.xlu1 %2392 }
 0xa98   : > { %3188 = vrsqrt.f32 %v2396_v38  ;;  %v2395_v40 = vmul.f32 0.03125, %v2393_v39 }
 0xa9a   : > { %v2397_v41 = vadd.f32 1e-05, %v2395_v40 }
 0xa9c   : > { %3190 = vrsqrt.f32 %v2397_v41 }
 0xaa2   : > { %v3189_v44 = vpop.eup %3188 }
 0xaa3   : > { %v2400_v45 = vmul.f32 %v3189_v44, %v2384_v25 }
 0xaa5   : > { %v2408_v52 = vmul.f32 %v2855_v46, %v2400_v45 }
 0xaa6   : > { %v3191_v50 = vpop.eup %3190 }
 0xaa7   : > { %v2401_v51 = vmul.f32 %v3191_v50, %v2385_v0  ;;  %v2416_v57 = vadd.f32 %v2856_v53, %v2408_v52 }
 0xaa9   : > { %v2409_v54 = vmul.f32 %v2855_v46, %v2401_v51 }
 0xaab   : > { %v2417_v55 = vadd.f32 %v2856_v53, %v2409_v54 }
 0xaad   : > { %v3100_v7 = vpack.c.bf16 %v2417_v55, %v2416_v57 }
 0xaaf   : > { %3101 = vmatpush3.bf16.msra.mxu0 %v3100_v7 }
 0xab2   : > { %3092 = vmatmul.mubr.msk.f32.vlgmr.msra.gmra.mrb[0].mxu0 %vm2425_vm11, %v2424_v58 }
 0xb85   : > { %v2495_v13 = vpop.f32.mrb[0].mxu0 }
 0xb86   : > { %v3093_v16 = vpop.f32.mrb[1].mxu0  ;;  %3095 = vmatpush3.xpose.msk.msra.mxu1 %vm926_vm1, %v2495_v13 }
 0xb89   : > { %3097 = vmatmul.mubr.msk.f32.vlgmr.msra.gmra.mrb[0].mxu1 %vm926_vm1, %v2499_v47 }
 0xc5c   : > { %v2582_v42 = vpop.f32.mrb[0].mxu1 }
 0xc5d   : > { %v2583_v61 = vadd.f32 %v2582_v42, %v2509_v60  ;;  %v3098_v62 = vpop.f32.mrb[1].mxu1 }
 0xc5f   : > { %2587 = vst.msk [vmem:[#allocation5] sm:$0x1] %vm2586_vm12, %v2583_v61 }
 0xc60 PF: > { %p3106_p6 = scmp.eq.s32.totalorder %s3363_s30, 1  ;;  %s3238_s10 = smov [#allocation5]  }
 0xc61   : > { %s2595_s29 = sshll.u32 %s3238_s10, 4  ;;  %s2596_s29 = int_to_ptr.vmem [resolvable:$true] %s2595_s29 }
 0xc62   : > { %s3192_s0 = scalar_lea.vmem %s2596_s29, 16  ;;  %s3198_s19 = scalar_lea.vmem %s2596_s29, 32 }
 0xc63   : > { %p3193_p7 = scmp.ne.s32.totalorder %s2596_s29, %s3192_s0  ;;  %p3199_p10 = scmp.lt.s32.totalorder %s2596_s29, %s2596_s29 }
 0xc64   : > { %p3200_p11 = scmp.lt.s32.totalorder %s3198_s19, %s3192_s0 }
 0xc65   : > { %p3194_p8 = pnand %p3193_p7, %p3106_p6 }
 0xc66   : > { %p3201_p12 = por %p3200_p11, %p3199_p10 }
 0xc67   : > { %p3195_p9 = pneg %p3194_p8 }
 0xc69   : > { %p3202_p13 = pnand %p3201_p12, %p3195_p9 }
 0xc6b   : > { %3205 = shalt.err (!%p3202_p13)
}
 0xc6c   : > { %s3870_s5 = sld [smem:[#allocation22_spill]] }
 0xc72   : > { %s3206_s6 = scalar_lea.hbm %s3870_s5, 16 }
 0xc73   : > { %p3207_p0 = scmp.ne.s32.totalorder %s3870_s5, %s3206_s6  ;;  %p3212_p3 = scmp.lt.u32.totalorder %s3206_s6, %s3870_s5 }
 0xc75   : > { %p3208_p1 = pnand %p3207_p0, %p3106_p6 }
 0xc77   : > { %p3209_p2 = pneg %p3208_p1 }
 0xc79   : > { %p3214_p4 = pnand %p3212_p3, %p3209_p2 }
 0xc7b   : > { %3217 = shalt.err (!%p3214_p4)
}
 0xc7c   : > { %3103 = dma.vmem_to_hbm [thread:$0]  (%p3106_p6), %s2596_s29, 16, %s3870_s5, [#allocation6]  }
 0xc7d   : > { %3223 = dma.done.wait (%p3106_p6), [#allocation6], 16  }
 0xc7e   : > { %3225 = vsyncadd (%p3106_p6), [#allocation6], 4294967280 }
 0xc7f PF: > { %s3871_s2 = sld [smem:[#allocation8_spill]] }
 0xc85   : > { %s35_s29 = sadd.s32 1, %s3871_s2  }
 0xc86   : > { %p32_p5 = scmp.ge.s32.totalorder %s35_s29, 4  }
 0xc88   :  { %34 = sbr.rel (!%p32_p5) target bundleno = 15 (0xf), region = 188 }
 0xc8f   :  { %2608 = vsyncpa [#allocation6], 1 }
 0xc90   :  { %2610 = vsyncpa [#allocation6 + $0x1], 1 }

</bundles_post_ra>
